<compile_context>
chip_gen: v7x
topology: tpu7x:2x2x1
jax: 0.10.0
libtpu: 0.0.40
codegen_flags: <defaults>
</compile_context>

<pallas_src>
import jax
import jax.numpy as jnp
from jax.experimental import pallas as pl
from jax.experimental.pallas import tpu as pltpu  # noqa: F401  (kept for parity)

# ----------------------------- small config ---------------------------------
B, S = 2, 8            # batch, sequence
H = 32                 # hidden size
NH, DH = 2, 16         # heads, head dim (NH * DH == H)
I = 64                 # FFN intermediate size
L = 2                  # encoder layers
V = 512                # vocab size of the mini BERT (logits last dim)
TYPE_VOCAB = 2
MAX_POS = 16
CLASSES = 4            # config.classes_num
WEIGHT_DIM = 30521     # hard-coded in the PyTorch module's self.weight
EPS = 1e-12            # BERT LayerNorm eps

assert S <= MAX_POS and NH * DH == H


# --------------------------- fused forward kernel -----------------------------
def _bert_fused_kernel(
    emb_ref, bias_ref,
    emb_ln_g_ref, emb_ln_b_ref,
    wqkv_ref, bqkv_ref, wo_ref, bo_ref, ln1_g_ref, ln1_b_ref,
    wi_ref, bi_ref, wo2_ref, bo2_ref, ln2_g_ref, ln2_b_ref,
    head_w_ref, head_b_ref, head_ln_g_ref, head_ln_b_ref,
    word_emb_t_ref, dec_b_ref,
    logits_ref,            # output: (B*S, V) — lane-dense, only HBM store
):
    def layernorm(x, g, b):
        # single pass: mean and mean-of-squares are independent lane reductions
        mu = jnp.mean(x, axis=-1, keepdims=True)
        ms = jnp.mean(x * x, axis=-1, keepdims=True)
        var = ms - mu * mu
        return (x - mu) * jax.lax.rsqrt(var + EPS) * g + b

    # TODO(synk): HF BERT uses exact erf-GELU; tanh approximation kept for TPU-safe lowering.
    def gelu(x):
        return jax.nn.gelu(x, approximate=True)

    T = B * S

    # additive mask bias at full score shape, loaded once (no per-layer broadcast)
    bias = bias_ref[...]                                   # (NH*B, S, S)

    # --- embedding LayerNorm ---
    x = layernorm(emb_ref[...], emb_ln_g_ref[...], emb_ln_b_ref[...])   # (T, H)

    # --- encoder layers (statically unrolled; all activations stay in VMEM) ---
    for l in range(L):
        # fused Q|K|V projection: (T, H) @ (H, 3H); attention scale pre-folded
        # into the Q columns by the wrapper.
        qkv = (jnp.dot(x, wqkv_ref[l], preferred_element_type=jnp.float32)
               + bqkv_ref[l])
        q, k, v = qkv[:, :H], qkv[:, H:2 * H], qkv[:, 2 * H:]

        def split_heads(t):
            # (T, H) -> (NH*B, S, DH): heads moved to the leading (batch) axis;
            # batch index = h*B + b, row order within each entry stays (b, s).
            return jnp.concatenate(
                [t[:, h * DH:(h + 1) * DH] for h in range(NH)], axis=0
            ).reshape(NH * B, S, DH)

        qh, kh, vh = split_heads(q), split_heads(k), split_heads(v)

        # batched scores + softmax + context: two 3-D dot_generals per layer
        s = jnp.einsum('bqd,bkd->bqk', qh, kh,
                       preferred_element_type=jnp.float32) + bias      # (NH*B, S, S)
        s = s - jnp.max(s, axis=-1, keepdims=True)
        p = jnp.exp(s)
        p = p * pl.reciprocal(jnp.sum(p, axis=-1, keepdims=True), approx=True)
        ctx = jnp.einsum('bqk,bkd->bqd', p, vh,
                         preferred_element_type=jnp.float32)           # (NH*B, S, DH)

        # heads back onto the lane axis: (NH*B, S, DH) -> (T, H); head h occupies
        # lane block [h*DH:(h+1)*DH] (standard BERT ordering). No VMEM scratch.
        ctx_flat = ctx.reshape(NH * T, DH)
        ctx2d = jnp.concatenate(
            [ctx_flat[h * T:(h + 1) * T, :] for h in range(NH)], axis=1)

        attn_out = (jnp.dot(ctx2d, wo_ref[l],
                            preferred_element_type=jnp.float32) + bo_ref[l])
        x = layernorm(x + attn_out, ln1_g_ref[l], ln1_b_ref[l])

        # feed-forward
        inter = gelu(jnp.dot(x, wi_ref[l],
                             preferred_element_type=jnp.float32) + bi_ref[l])
        ffn = (jnp.dot(inter, wo2_ref[l],
                       preferred_element_type=jnp.float32) + bo2_ref[l])
        x = layernorm(x + ffn, ln2_g_ref[l], ln2_b_ref[l])

    # --- MLM head ---
    hm = gelu(jnp.dot(x, head_w_ref[...],
                      preferred_element_type=jnp.float32) + head_b_ref[...])
    hm = layernorm(hm, head_ln_g_ref[...], head_ln_b_ref[...])

    # decoder (weight tying): word_emb pre-transposed to (H, V) in the wrapper,
    # so this is a plain lane-dense (T, H) @ (H, V) matmul.
    logits_ref[...] = (jnp.dot(hm, word_emb_t_ref[...],
                               preferred_element_type=jnp.float32) + dec_b_ref[...])


# --------------------------- parameter synthesis ------------------------------
def init_params(key):
    keys = iter(jax.random.split(key, 64))

    def nrm(shape, scale=0.02):
        return (scale * jax.random.normal(next(keys), shape)).astype(jnp.float32)

    def ones(shape):
        return jnp.ones(shape, jnp.float32)

    def zeros(shape):
        return jnp.zeros(shape, jnp.float32)

    params = {
        "word_emb": nrm((V, H)),
        "pos_emb": nrm((MAX_POS, H)),
        "type_emb": nrm((TYPE_VOCAB, H)),
        "emb_ln_g": ones((1, H)), "emb_ln_b": zeros((1, H)),
        # per-layer weights stacked over L; Q|K|V fused into one (H, 3H) weight
        "wqkv": jnp.stack([jnp.concatenate([nrm((H, H)), nrm((H, H)), nrm((H, H))],
                                           axis=1) for _ in range(L)]),
        "bqkv": zeros((L, 1, 3 * H)),
        "wo": jnp.stack([nrm((H, H)) for _ in range(L)]),
        "bo": zeros((L, 1, H)),
        "ln1_g": ones((L, 1, H)), "ln1_b": zeros((L, 1, H)),
        "wi": jnp.stack([nrm((H, I)) for _ in range(L)]),
        "bi": zeros((L, 1, I)),
        "wo2": jnp.stack([nrm((I, H)) for _ in range(L)]),
        "bo2": zeros((L, 1, H)),
        "ln2_g": ones((L, 1, H)), "ln2_b": zeros((L, 1, H)),
        # MLM head (decoder weight tied to word embeddings)
        "head_dense_w": nrm((H, H)),
        "head_dense_b": zeros((1, H)),
        "head_ln_g": ones((1, H)), "head_ln_b": zeros((1, H)),
        "decoder_b": zeros((1, V)),
        # PteModel.weight = ones((classes_num, 30521)), returned as-is.
        "weight": jnp.ones((CLASSES, WEIGHT_DIM), jnp.float32),
    }
    return params


# ------------------------------ forward pass ----------------------------------
def pte_model_forward(params, input_ids, token_type_ids, attention_mask):
    """Returns (logits, weight) — mirrors PteModel.forward."""
    # --- embeddings (gather is plain-JAX glue) ---
    emb = (jnp.take(params["word_emb"], input_ids, axis=0)
           + params["pos_emb"][:S][None, :, :]
           + jnp.take(params["type_emb"], token_type_ids, axis=0))
    emb = emb.reshape(B * S, H).astype(jnp.float32)

    # additive padding-mask bias precomputed at the full (NH*B, S, S) score
    # shape (batch index = h*B + b) — the kernel never re-broadcasts it.
    mask_bias = (1.0 - attention_mask.astype(jnp.float32)) * -10000.0       # (B, S)
    bias = jnp.broadcast_to(mask_bias[None, :, None, :], (NH, B, S, S))
    bias = bias.reshape(NH * B, S, S)

    # fold the 1/sqrt(DH) attention scale into the Q columns of the fused QKV
    # weight/bias (mathematically identical, saves a per-layer VPU multiply).
    qkv_scale = jnp.concatenate(
        [jnp.full((1, 1, H), 1.0 / (DH ** 0.5), jnp.float32),
         jnp.ones((1, 1, 2 * H), jnp.float32)], axis=-1)                    # (1,1,3H)
    wqkv = params["wqkv"] * qkv_scale
    bqkv = params["bqkv"] * qkv_scale

    # decoder weight pre-transposed to (H, V): keeps the logits matmul
    # lane-dense and avoids an in-kernel transpose of the largest tensor.
    word_emb_t = params["word_emb"].T

    # NOTE: grid=() — single TensorCore. For realistic batch sizes, add a grid
    # over batch with dimension_semantics=("parallel",) to engage the second
    # v7x core; at B=2 the per-step overhead outweighs the split.
    logits = pl.pallas_call(
        _bert_fused_kernel,
        out_shape=jax.ShapeDtypeStruct((B * S, V), jnp.float32),
    )(emb, bias,
      params["emb_ln_g"], params["emb_ln_b"],
      wqkv, bqkv, params["wo"], params["bo"],
      params["ln1_g"], params["ln1_b"],
      params["wi"], params["bi"], params["wo2"], params["bo2"],
      params["ln2_g"], params["ln2_b"],
      params["head_dense_w"], params["head_dense_b"],
      params["head_ln_g"], params["head_ln_b"],
      word_emb_t, params["decoder_b"])

    return logits.reshape(B, S, V), params["weight"]


# ---------------------------------- main ---------------------------------------
if __name__ == "__main__":
    key = jax.random.PRNGKey(0)
    pkey, ikey = jax.random.split(key)
    params = init_params(pkey)

    input_ids = jax.random.randint(ikey, (B, S), 0, V, dtype=jnp.int32)
    token_type_ids = jnp.zeros((B, S), dtype=jnp.int32)
    attention_mask = jnp.ones((B, S), dtype=jnp.int32)

    fwd = jax.jit(pte_model_forward)
    logits, weight = fwd(params, input_ids, token_type_ids, attention_mask)
    jax.block_until_ready((logits, weight))

    assert logits.shape == (B, S, V) and logits.dtype == jnp.float32
    assert weight.shape == (CLASSES, WEIGHT_DIM)
    assert bool(jnp.all(jnp.isfinite(logits)))
    print("KERNEL_OK")
</pallas_src>

<mosaic_0001>
module attributes {stable_mosaic.version = 11 : i64} {
  func.func @_bert_fused_kernel(%arg0: memref<16x32xf32, #tpu.memory_space<vmem>>, %arg1: memref<4x8x8xf32, #tpu.memory_space<vmem>>, %arg2: memref<1x32xf32, #tpu.memory_space<vmem>>, %arg3: memref<1x32xf32, #tpu.memory_space<vmem>>, %arg4: memref<2x32x96xf32, #tpu.memory_space<vmem>>, %arg5: memref<2x1x96xf32, #tpu.memory_space<vmem>>, %arg6: memref<2x32x32xf32, #tpu.memory_space<vmem>>, %arg7: memref<2x1x32xf32, #tpu.memory_space<vmem>>, %arg8: memref<2x1x32xf32, #tpu.memory_space<vmem>>, %arg9: memref<2x1x32xf32, #tpu.memory_space<vmem>>, %arg10: memref<2x32x64xf32, #tpu.memory_space<vmem>>, %arg11: memref<2x1x64xf32, #tpu.memory_space<vmem>>, %arg12: memref<2x64x32xf32, #tpu.memory_space<vmem>>, %arg13: memref<2x1x32xf32, #tpu.memory_space<vmem>>, %arg14: memref<2x1x32xf32, #tpu.memory_space<vmem>>, %arg15: memref<2x1x32xf32, #tpu.memory_space<vmem>>, %arg16: memref<32x32xf32, #tpu.memory_space<vmem>>, %arg17: memref<1x32xf32, #tpu.memory_space<vmem>>, %arg18: memref<1x32xf32, #tpu.memory_space<vmem>>, %arg19: memref<1x32xf32, #tpu.memory_space<vmem>>, %arg20: memref<32x512xf32, #tpu.memory_space<vmem>>, %arg21: memref<1x512xf32, #tpu.memory_space<vmem>>, %arg22: memref<16x512xf32, #tpu.memory_space<vmem>>) attributes {dimension_semantics = [], scalar_prefetch = 0 : i64, scratch_operands = 0 : i64, tpu.core_type = #tpu.core_type<tc>} {
    %c0 = arith.constant 0 : index
    %c0_0 = arith.constant 0 : index
    %c0_1 = arith.constant 0 : index
    %0 = vector.load %arg1[%c0, %c0_0, %c0_1] : memref<4x8x8xf32, #tpu.memory_space<vmem>>, vector<4x8x8xf32>
    %c0_2 = arith.constant 0 : index
    %c0_3 = arith.constant 0 : index
    %1 = vector.load %arg0[%c0_2, %c0_3] : memref<16x32xf32, #tpu.memory_space<vmem>>, vector<16x32xf32>
    %c0_4 = arith.constant 0 : index
    %c0_5 = arith.constant 0 : index
    %2 = vector.load %arg2[%c0_4, %c0_5] : memref<1x32xf32, #tpu.memory_space<vmem>>, vector<1x32xf32>
    %c0_6 = arith.constant 0 : index
    %c0_7 = arith.constant 0 : index
    %3 = vector.load %arg3[%c0_6, %c0_7] : memref<1x32xf32, #tpu.memory_space<vmem>>, vector<1x32xf32>
    %cst = arith.constant dense<0.000000e+00> : vector<16xf32>
    %4 = vector.multi_reduction <add>, %1, %cst [1] : vector<16x32xf32> to vector<16xf32>
    %5 = vector.shape_cast %4 : vector<16xf32> to vector<16x1xf32>
    %cst_8 = arith.constant 3.200000e+01 : f32
    %6 = vector.broadcast %cst_8 : f32 to vector<16x1xf32>
    %7 = arith.divf %5, %6 : vector<16x1xf32>
    %8 = arith.mulf %1, %1 : vector<16x32xf32>
    %cst_9 = arith.constant dense<0.000000e+00> : vector<16xf32>
    %9 = vector.multi_reduction <add>, %8, %cst_9 [1] : vector<16x32xf32> to vector<16xf32>
    %10 = vector.shape_cast %9 : vector<16xf32> to vector<16x1xf32>
    %cst_10 = arith.constant 3.200000e+01 : f32
    %11 = vector.broadcast %cst_10 : f32 to vector<16x1xf32>
    %12 = arith.divf %10, %11 : vector<16x1xf32>
    %13 = arith.mulf %7, %7 : vector<16x1xf32>
    %14 = arith.subf %12, %13 : vector<16x1xf32>
    %15 = vector.broadcast %7 : vector<16x1xf32> to vector<16x32xf32>
    %16 = arith.subf %1, %15 : vector<16x32xf32>
    %cst_11 = arith.constant 9.99999996E-13 : f32
    %17 = vector.broadcast %cst_11 : f32 to vector<16x1xf32>
    %18 = arith.addf %14, %17 : vector<16x1xf32>
    %19 = math.rsqrt %18 : vector<16x1xf32>
    %20 = vector.broadcast %19 : vector<16x1xf32> to vector<16x32xf32>
    %21 = arith.mulf %16, %20 : vector<16x32xf32>
    %22 = vector.broadcast %2 : vector<1x32xf32> to vector<16x32xf32>
    %23 = arith.mulf %21, %22 : vector<16x32xf32>
    %24 = vector.broadcast %3 : vector<1x32xf32> to vector<16x32xf32>
    %25 = arith.addf %23, %24 : vector<16x32xf32>
    %c0_12 = arith.constant 0 : index
    %c0_13 = arith.constant 0 : index
    %c0_14 = arith.constant 0 : index
    %26 = vector.load %arg4[%c0_12, %c0_13, %c0_14] : memref<2x32x96xf32, #tpu.memory_space<vmem>>, vector<1x32x96xf32>
    %27 = vector.shape_cast %26 : vector<1x32x96xf32> to vector<32x96xf32>
    %cst_15 = arith.constant dense<0.000000e+00> : vector<16x96xf32>
    %28 = tpu.matmul %25, %27, %cst_15 {dimension_numbers = #tpu.dot_dimension_numbers<[1], [0], [0], [1], [0, 0, 1, 1], [], []>} : vector<16x32xf32>, vector<32x96xf32>, vector<16x96xf32> -> vector<16x96xf32>
    %c0_16 = arith.constant 0 : index
    %c0_17 = arith.constant 0 : index
    %c0_18 = arith.constant 0 : index
    %29 = vector.load %arg5[%c0_16, %c0_17, %c0_18] : memref<2x1x96xf32, #tpu.memory_space<vmem>>, vector<1x1x96xf32>
    %30 = vector.shape_cast %29 : vector<1x1x96xf32> to vector<1x96xf32>
    %31 = vector.broadcast %30 : vector<1x96xf32> to vector<16x96xf32>
    %32 = arith.addf %28, %31 : vector<16x96xf32>
    %33 = vector.extract_strided_slice %32 {offsets = [0, 0], sizes = [16, 32], strides = [1, 1]} : vector<16x96xf32> to vector<16x32xf32>
    %34 = vector.extract_strided_slice %32 {offsets = [0, 32], sizes = [16, 32], strides = [1, 1]} : vector<16x96xf32> to vector<16x32xf32>
    %35 = vector.extract_strided_slice %32 {offsets = [0, 64], sizes = [16, 32], strides = [1, 1]} : vector<16x96xf32> to vector<16x32xf32>
    %36 = vector.extract_strided_slice %33 {offsets = [0, 0], sizes = [16, 16], strides = [1, 1]} : vector<16x32xf32> to vector<16x16xf32>
    %37 = vector.extract_strided_slice %33 {offsets = [0, 16], sizes = [16, 16], strides = [1, 1]} : vector<16x32xf32> to vector<16x16xf32>
    %38 = tpu.concatenate %36, %37 in 0 : vector<16x16xf32>, vector<16x16xf32> -> vector<32x16xf32>
    %39 = vector.shape_cast %38 : vector<32x16xf32> to vector<4x8x16xf32>
    %40 = vector.extract_strided_slice %34 {offsets = [0, 0], sizes = [16, 16], strides = [1, 1]} : vector<16x32xf32> to vector<16x16xf32>
    %41 = vector.extract_strided_slice %34 {offsets = [0, 16], sizes = [16, 16], strides = [1, 1]} : vector<16x32xf32> to vector<16x16xf32>
    %42 = tpu.concatenate %40, %41 in 0 : vector<16x16xf32>, vector<16x16xf32> -> vector<32x16xf32>
    %43 = vector.shape_cast %42 : vector<32x16xf32> to vector<4x8x16xf32>
    %44 = vector.extract_strided_slice %35 {offsets = [0, 0], sizes = [16, 16], strides = [1, 1]} : vector<16x32xf32> to vector<16x16xf32>
    %45 = vector.extract_strided_slice %35 {offsets = [0, 16], sizes = [16, 16], strides = [1, 1]} : vector<16x32xf32> to vector<16x16xf32>
    %46 = tpu.concatenate %44, %45 in 0 : vector<16x16xf32>, vector<16x16xf32> -> vector<32x16xf32>
    %47 = vector.shape_cast %46 : vector<32x16xf32> to vector<4x8x16xf32>
    "tpu.trace_start"() <{level = 10 : i32, message = "bqd,bkd->bqk"}> : () -> ()
    %cst_19 = arith.constant dense<0.000000e+00> : vector<4x8x8xf32>
    %48 = tpu.matmul %39, %43, %cst_19 {dimension_numbers = #tpu.dot_dimension_numbers<[2], [2], [1], [1], [0, 0, 0, 1, 1, 1], [0], [0]>} : vector<4x8x16xf32>, vector<4x8x16xf32>, vector<4x8x8xf32> -> vector<4x8x8xf32>
    "tpu.trace_stop"() : () -> ()
    %49 = arith.addf %48, %0 : vector<4x8x8xf32>
    %cst_20 = arith.constant dense<0xFF800000> : vector<4x8xf32>
    %50 = vector.multi_reduction <maximumf>, %49, %cst_20 [2] : vector<4x8x8xf32> to vector<4x8xf32>
    %51 = vector.shape_cast %50 : vector<4x8xf32> to vector<4x8x1xf32>
    %52 = vector.broadcast %51 : vector<4x8x1xf32> to vector<4x8x8xf32>
    %53 = arith.subf %49, %52 : vector<4x8x8xf32>
    %54 = math.exp %53 : vector<4x8x8xf32>
    %cst_21 = arith.constant dense<0.000000e+00> : vector<4x8xf32>
    %55 = vector.multi_reduction <add>, %54, %cst_21 [2] : vector<4x8x8xf32> to vector<4x8xf32>
    %56 = vector.shape_cast %55 : vector<4x8xf32> to vector<4x8x1xf32>
    %57 = tpu.reciprocal %56 {approx = true} : vector<4x8x1xf32> -> vector<4x8x1xf32>
    %58 = vector.broadcast %57 : vector<4x8x1xf32> to vector<4x8x8xf32>
    %59 = arith.mulf %54, %58 : vector<4x8x8xf32>
    "tpu.trace_start"() <{level = 10 : i32, message = "bqk,bkd->bqd"}> : () -> ()
    %cst_22 = arith.constant dense<0.000000e+00> : vector<4x8x16xf32>
    %60 = tpu.matmul %59, %47, %cst_22 {dimension_numbers = #tpu.dot_dimension_numbers<[2], [1], [1], [2], [0, 0, 0, 1, 1, 2], [0], [0]>} : vector<4x8x8xf32>, vector<4x8x16xf32>, vector<4x8x16xf32> -> vector<4x8x16xf32>
    "tpu.trace_stop"() : () -> ()
    %61 = vector.shape_cast %60 : vector<4x8x16xf32> to vector<32x16xf32>
    %62 = vector.extract_strided_slice %61 {offsets = [0, 0], sizes = [16, 16], strides = [1, 1]} : vector<32x16xf32> to vector<16x16xf32>
    %63 = vector.extract_strided_slice %61 {offsets = [16, 0], sizes = [16, 16], strides = [1, 1]} : vector<32x16xf32> to vector<16x16xf32>
    %64 = tpu.concatenate %62, %63 in 1 : vector<16x16xf32>, vector<16x16xf32> -> vector<16x32xf32>
    %c0_23 = arith.constant 0 : index
    %c0_24 = arith.constant 0 : index
    %c0_25 = arith.constant 0 : index
    %65 = vector.load %arg6[%c0_23, %c0_24, %c0_25] : memref<2x32x32xf32, #tpu.memory_space<vmem>>, vector<1x32x32xf32>
    %66 = vector.shape_cast %65 : vector<1x32x32xf32> to vector<32x32xf32>
    %cst_26 = arith.constant dense<0.000000e+00> : vector<16x32xf32>
    %67 = tpu.matmul %64, %66, %cst_26 {dimension_numbers = #tpu.dot_dimension_numbers<[1], [0], [0], [1], [0, 0, 1, 1], [], []>} : vector<16x32xf32>, vector<32x32xf32>, vector<16x32xf32> -> vector<16x32xf32>
    %c0_27 = arith.constant 0 : index
    %c0_28 = arith.constant 0 : index
    %c0_29 = arith.constant 0 : index
    %68 = vector.load %arg7[%c0_27, %c0_28, %c0_29] : memref<2x1x32xf32, #tpu.memory_space<vmem>>, vector<1x1x32xf32>
    %69 = vector.shape_cast %68 : vector<1x1x32xf32> to vector<1x32xf32>
    %70 = vector.broadcast %69 : vector<1x32xf32> to vector<16x32xf32>
    %71 = arith.addf %67, %70 : vector<16x32xf32>
    %72 = arith.addf %25, %71 : vector<16x32xf32>
    %c0_30 = arith.constant 0 : index
    %c0_31 = arith.constant 0 : index
    %c0_32 = arith.constant 0 : index
    %73 = vector.load %arg8[%c0_30, %c0_31, %c0_32] : memref<2x1x32xf32, #tpu.memory_space<vmem>>, vector<1x1x32xf32>
    %74 = vector.shape_cast %73 : vector<1x1x32xf32> to vector<1x32xf32>
    %c0_33 = arith.constant 0 : index
    %c0_34 = arith.constant 0 : index
    %c0_35 = arith.constant 0 : index
    %75 = vector.load %arg9[%c0_33, %c0_34, %c0_35] : memref<2x1x32xf32, #tpu.memory_space<vmem>>, vector<1x1x32xf32>
    %76 = vector.shape_cast %75 : vector<1x1x32xf32> to vector<1x32xf32>
    %cst_36 = arith.constant dense<0.000000e+00> : vector<16xf32>
    %77 = vector.multi_reduction <add>, %72, %cst_36 [1] : vector<16x32xf32> to vector<16xf32>
    %78 = vector.shape_cast %77 : vector<16xf32> to vector<16x1xf32>
    %cst_37 = arith.constant 3.200000e+01 : f32
    %79 = vector.broadcast %cst_37 : f32 to vector<16x1xf32>
    %80 = arith.divf %78, %79 : vector<16x1xf32>
    %81 = arith.mulf %72, %72 : vector<16x32xf32>
    %cst_38 = arith.constant dense<0.000000e+00> : vector<16xf32>
    %82 = vector.multi_reduction <add>, %81, %cst_38 [1] : vector<16x32xf32> to vector<16xf32>
    %83 = vector.shape_cast %82 : vector<16xf32> to vector<16x1xf32>
    %cst_39 = arith.constant 3.200000e+01 : f32
    %84 = vector.broadcast %cst_39 : f32 to vector<16x1xf32>
    %85 = arith.divf %83, %84 : vector<16x1xf32>
    %86 = arith.mulf %80, %80 : vector<16x1xf32>
    %87 = arith.subf %85, %86 : vector<16x1xf32>
    %88 = vector.broadcast %80 : vector<16x1xf32> to vector<16x32xf32>
    %89 = arith.subf %72, %88 : vector<16x32xf32>
    %cst_40 = arith.constant 9.99999996E-13 : f32
    %90 = vector.broadcast %cst_40 : f32 to vector<16x1xf32>
    %91 = arith.addf %87, %90 : vector<16x1xf32>
    %92 = math.rsqrt %91 : vector<16x1xf32>
    %93 = vector.broadcast %92 : vector<16x1xf32> to vector<16x32xf32>
    %94 = arith.mulf %89, %93 : vector<16x32xf32>
    %95 = vector.broadcast %74 : vector<1x32xf32> to vector<16x32xf32>
    %96 = arith.mulf %94, %95 : vector<16x32xf32>
    %97 = vector.broadcast %76 : vector<1x32xf32> to vector<16x32xf32>
    %98 = arith.addf %96, %97 : vector<16x32xf32>
    %c0_41 = arith.constant 0 : index
    %c0_42 = arith.constant 0 : index
    %c0_43 = arith.constant 0 : index
    %99 = vector.load %arg10[%c0_41, %c0_42, %c0_43] : memref<2x32x64xf32, #tpu.memory_space<vmem>>, vector<1x32x64xf32>
    %100 = vector.shape_cast %99 : vector<1x32x64xf32> to vector<32x64xf32>
    %cst_44 = arith.constant dense<0.000000e+00> : vector<16x64xf32>
    %101 = tpu.matmul %98, %100, %cst_44 {dimension_numbers = #tpu.dot_dimension_numbers<[1], [0], [0], [1], [0, 0, 1, 1], [], []>} : vector<16x32xf32>, vector<32x64xf32>, vector<16x64xf32> -> vector<16x64xf32>
    %c0_45 = arith.constant 0 : index
    %c0_46 = arith.constant 0 : index
    %c0_47 = arith.constant 0 : index
    %102 = vector.load %arg11[%c0_45, %c0_46, %c0_47] : memref<2x1x64xf32, #tpu.memory_space<vmem>>, vector<1x1x64xf32>
    %103 = vector.shape_cast %102 : vector<1x1x64xf32> to vector<1x64xf32>
    %104 = vector.broadcast %103 : vector<1x64xf32> to vector<16x64xf32>
    %105 = arith.addf %101, %104 : vector<16x64xf32>
    %106 = arith.mulf %105, %105 : vector<16x64xf32>
    %107 = arith.mulf %105, %106 : vector<16x64xf32>
    %cst_48 = arith.constant 4.471500e-02 : f32
    %108 = vector.broadcast %cst_48 : f32 to vector<16x64xf32>
    %109 = arith.mulf %108, %107 : vector<16x64xf32>
    %110 = arith.addf %105, %109 : vector<16x64xf32>
    %cst_49 = arith.constant 0.797884583 : f32
    %111 = vector.broadcast %cst_49 : f32 to vector<16x64xf32>
    %112 = arith.mulf %111, %110 : vector<16x64xf32>
    %113 = math.tanh %112 : vector<16x64xf32>
    %cst_50 = arith.constant 1.000000e+00 : f32
    %114 = vector.broadcast %cst_50 : f32 to vector<16x64xf32>
    %115 = arith.addf %114, %113 : vector<16x64xf32>
    %cst_51 = arith.constant 5.000000e-01 : f32
    %116 = vector.broadcast %cst_51 : f32 to vector<16x64xf32>
    %117 = arith.mulf %116, %115 : vector<16x64xf32>
    %118 = arith.mulf %105, %117 : vector<16x64xf32>
    %c0_52 = arith.constant 0 : index
    %c0_53 = arith.constant 0 : index
    %c0_54 = arith.constant 0 : index
    %119 = vector.load %arg12[%c0_52, %c0_53, %c0_54] : memref<2x64x32xf32, #tpu.memory_space<vmem>>, vector<1x64x32xf32>
    %120 = vector.shape_cast %119 : vector<1x64x32xf32> to vector<64x32xf32>
    %cst_55 = arith.constant dense<0.000000e+00> : vector<16x32xf32>
    %121 = tpu.matmul %118, %120, %cst_55 {dimension_numbers = #tpu.dot_dimension_numbers<[1], [0], [0], [1], [0, 0, 1, 1], [], []>} : vector<16x64xf32>, vector<64x32xf32>, vector<16x32xf32> -> vector<16x32xf32>
    %c0_56 = arith.constant 0 : index
    %c0_57 = arith.constant 0 : index
    %c0_58 = arith.constant 0 : index
    %122 = vector.load %arg13[%c0_56, %c0_57, %c0_58] : memref<2x1x32xf32, #tpu.memory_space<vmem>>, vector<1x1x32xf32>
    %123 = vector.shape_cast %122 : vector<1x1x32xf32> to vector<1x32xf32>
    %124 = vector.broadcast %123 : vector<1x32xf32> to vector<16x32xf32>
    %125 = arith.addf %121, %124 : vector<16x32xf32>
    %126 = arith.addf %98, %125 : vector<16x32xf32>
    %c0_59 = arith.constant 0 : index
    %c0_60 = arith.constant 0 : index
    %c0_61 = arith.constant 0 : index
    %127 = vector.load %arg14[%c0_59, %c0_60, %c0_61] : memref<2x1x32xf32, #tpu.memory_space<vmem>>, vector<1x1x32xf32>
    %128 = vector.shape_cast %127 : vector<1x1x32xf32> to vector<1x32xf32>
    %c0_62 = arith.constant 0 : index
    %c0_63 = arith.constant 0 : index
    %c0_64 = arith.constant 0 : index
    %129 = vector.load %arg15[%c0_62, %c0_63, %c0_64] : memref<2x1x32xf32, #tpu.memory_space<vmem>>, vector<1x1x32xf32>
    %130 = vector.shape_cast %129 : vector<1x1x32xf32> to vector<1x32xf32>
    %cst_65 = arith.constant dense<0.000000e+00> : vector<16xf32>
    %131 = vector.multi_reduction <add>, %126, %cst_65 [1] : vector<16x32xf32> to vector<16xf32>
    %132 = vector.shape_cast %131 : vector<16xf32> to vector<16x1xf32>
    %cst_66 = arith.constant 3.200000e+01 : f32
    %133 = vector.broadcast %cst_66 : f32 to vector<16x1xf32>
    %134 = arith.divf %132, %133 : vector<16x1xf32>
    %135 = arith.mulf %126, %126 : vector<16x32xf32>
    %cst_67 = arith.constant dense<0.000000e+00> : vector<16xf32>
    %136 = vector.multi_reduction <add>, %135, %cst_67 [1] : vector<16x32xf32> to vector<16xf32>
    %137 = vector.shape_cast %136 : vector<16xf32> to vector<16x1xf32>
    %cst_68 = arith.constant 3.200000e+01 : f32
    %138 = vector.broadcast %cst_68 : f32 to vector<16x1xf32>
    %139 = arith.divf %137, %138 : vector<16x1xf32>
    %140 = arith.mulf %134, %134 : vector<16x1xf32>
    %141 = arith.subf %139, %140 : vector<16x1xf32>
    %142 = vector.broadcast %134 : vector<16x1xf32> to vector<16x32xf32>
    %143 = arith.subf %126, %142 : vector<16x32xf32>
    %cst_69 = arith.constant 9.99999996E-13 : f32
    %144 = vector.broadcast %cst_69 : f32 to vector<16x1xf32>
    %145 = arith.addf %141, %144 : vector<16x1xf32>
    %146 = math.rsqrt %145 : vector<16x1xf32>
    %147 = vector.broadcast %146 : vector<16x1xf32> to vector<16x32xf32>
    %148 = arith.mulf %143, %147 : vector<16x32xf32>
    %149 = vector.broadcast %128 : vector<1x32xf32> to vector<16x32xf32>
    %150 = arith.mulf %148, %149 : vector<16x32xf32>
    %151 = vector.broadcast %130 : vector<1x32xf32> to vector<16x32xf32>
    %152 = arith.addf %150, %151 : vector<16x32xf32>
    %c1 = arith.constant 1 : index
    %c0_70 = arith.constant 0 : index
    %c0_71 = arith.constant 0 : index
    %153 = vector.load %arg4[%c1, %c0_70, %c0_71] : memref<2x32x96xf32, #tpu.memory_space<vmem>>, vector<1x32x96xf32>
    %154 = vector.shape_cast %153 : vector<1x32x96xf32> to vector<32x96xf32>
    %cst_72 = arith.constant dense<0.000000e+00> : vector<16x96xf32>
    %155 = tpu.matmul %152, %154, %cst_72 {dimension_numbers = #tpu.dot_dimension_numbers<[1], [0], [0], [1], [0, 0, 1, 1], [], []>} : vector<16x32xf32>, vector<32x96xf32>, vector<16x96xf32> -> vector<16x96xf32>
    %c1_73 = arith.constant 1 : index
    %c0_74 = arith.constant 0 : index
    %c0_75 = arith.constant 0 : index
    %156 = vector.load %arg5[%c1_73, %c0_74, %c0_75] : memref<2x1x96xf32, #tpu.memory_space<vmem>>, vector<1x1x96xf32>
    %157 = vector.shape_cast %156 : vector<1x1x96xf32> to vector<1x96xf32>
    %158 = vector.broadcast %157 : vector<1x96xf32> to vector<16x96xf32>
    %159 = arith.addf %155, %158 : vector<16x96xf32>
    %160 = vector.extract_strided_slice %159 {offsets = [0, 0], sizes = [16, 32], strides = [1, 1]} : vector<16x96xf32> to vector<16x32xf32>
    %161 = vector.extract_strided_slice %159 {offsets = [0, 32], sizes = [16, 32], strides = [1, 1]} : vector<16x96xf32> to vector<16x32xf32>
    %162 = vector.extract_strided_slice %159 {offsets = [0, 64], sizes = [16, 32], strides = [1, 1]} : vector<16x96xf32> to vector<16x32xf32>
    %163 = vector.extract_strided_slice %160 {offsets = [0, 0], sizes = [16, 16], strides = [1, 1]} : vector<16x32xf32> to vector<16x16xf32>
    %164 = vector.extract_strided_slice %160 {offsets = [0, 16], sizes = [16, 16], strides = [1, 1]} : vector<16x32xf32> to vector<16x16xf32>
    %165 = tpu.concatenate %163, %164 in 0 : vector<16x16xf32>, vector<16x16xf32> -> vector<32x16xf32>
    %166 = vector.shape_cast %165 : vector<32x16xf32> to vector<4x8x16xf32>
    %167 = vector.extract_strided_slice %161 {offsets = [0, 0], sizes = [16, 16], strides = [1, 1]} : vector<16x32xf32> to vector<16x16xf32>
    %168 = vector.extract_strided_slice %161 {offsets = [0, 16], sizes = [16, 16], strides = [1, 1]} : vector<16x32xf32> to vector<16x16xf32>
    %169 = tpu.concatenate %167, %168 in 0 : vector<16x16xf32>, vector<16x16xf32> -> vector<32x16xf32>
    %170 = vector.shape_cast %169 : vector<32x16xf32> to vector<4x8x16xf32>
    %171 = vector.extract_strided_slice %162 {offsets = [0, 0], sizes = [16, 16], strides = [1, 1]} : vector<16x32xf32> to vector<16x16xf32>
    %172 = vector.extract_strided_slice %162 {offsets = [0, 16], sizes = [16, 16], strides = [1, 1]} : vector<16x32xf32> to vector<16x16xf32>
    %173 = tpu.concatenate %171, %172 in 0 : vector<16x16xf32>, vector<16x16xf32> -> vector<32x16xf32>
    %174 = vector.shape_cast %173 : vector<32x16xf32> to vector<4x8x16xf32>
    "tpu.trace_start"() <{level = 10 : i32, message = "bqd,bkd->bqk"}> : () -> ()
    %cst_76 = arith.constant dense<0.000000e+00> : vector<4x8x8xf32>
    %175 = tpu.matmul %166, %170, %cst_76 {dimension_numbers = #tpu.dot_dimension_numbers<[2], [2], [1], [1], [0, 0, 0, 1, 1, 1], [0], [0]>} : vector<4x8x16xf32>, vector<4x8x16xf32>, vector<4x8x8xf32> -> vector<4x8x8xf32>
    "tpu.trace_stop"() : () -> ()
    %176 = arith.addf %175, %0 : vector<4x8x8xf32>
    %cst_77 = arith.constant dense<0xFF800000> : vector<4x8xf32>
    %177 = vector.multi_reduction <maximumf>, %176, %cst_77 [2] : vector<4x8x8xf32> to vector<4x8xf32>
    %178 = vector.shape_cast %177 : vector<4x8xf32> to vector<4x8x1xf32>
    %179 = vector.broadcast %178 : vector<4x8x1xf32> to vector<4x8x8xf32>
    %180 = arith.subf %176, %179 : vector<4x8x8xf32>
    %181 = math.exp %180 : vector<4x8x8xf32>
    %cst_78 = arith.constant dense<0.000000e+00> : vector<4x8xf32>
    %182 = vector.multi_reduction <add>, %181, %cst_78 [2] : vector<4x8x8xf32> to vector<4x8xf32>
    %183 = vector.shape_cast %182 : vector<4x8xf32> to vector<4x8x1xf32>
    %184 = tpu.reciprocal %183 {approx = true} : vector<4x8x1xf32> -> vector<4x8x1xf32>
    %185 = vector.broadcast %184 : vector<4x8x1xf32> to vector<4x8x8xf32>
    %186 = arith.mulf %181, %185 : vector<4x8x8xf32>
    "tpu.trace_start"() <{level = 10 : i32, message = "bqk,bkd->bqd"}> : () -> ()
    %cst_79 = arith.constant dense<0.000000e+00> : vector<4x8x16xf32>
    %187 = tpu.matmul %186, %174, %cst_79 {dimension_numbers = #tpu.dot_dimension_numbers<[2], [1], [1], [2], [0, 0, 0, 1, 1, 2], [0], [0]>} : vector<4x8x8xf32>, vector<4x8x16xf32>, vector<4x8x16xf32> -> vector<4x8x16xf32>
    "tpu.trace_stop"() : () -> ()
    %188 = vector.shape_cast %187 : vector<4x8x16xf32> to vector<32x16xf32>
    %189 = vector.extract_strided_slice %188 {offsets = [0, 0], sizes = [16, 16], strides = [1, 1]} : vector<32x16xf32> to vector<16x16xf32>
    %190 = vector.extract_strided_slice %188 {offsets = [16, 0], sizes = [16, 16], strides = [1, 1]} : vector<32x16xf32> to vector<16x16xf32>
    %191 = tpu.concatenate %189, %190 in 1 : vector<16x16xf32>, vector<16x16xf32> -> vector<16x32xf32>
    %c1_80 = arith.constant 1 : index
    %c0_81 = arith.constant 0 : index
    %c0_82 = arith.constant 0 : index
    %192 = vector.load %arg6[%c1_80, %c0_81, %c0_82] : memref<2x32x32xf32, #tpu.memory_space<vmem>>, vector<1x32x32xf32>
    %193 = vector.shape_cast %192 : vector<1x32x32xf32> to vector<32x32xf32>
    %cst_83 = arith.constant dense<0.000000e+00> : vector<16x32xf32>
    %194 = tpu.matmul %191, %193, %cst_83 {dimension_numbers = #tpu.dot_dimension_numbers<[1], [0], [0], [1], [0, 0, 1, 1], [], []>} : vector<16x32xf32>, vector<32x32xf32>, vector<16x32xf32> -> vector<16x32xf32>
    %c1_84 = arith.constant 1 : index
    %c0_85 = arith.constant 0 : index
    %c0_86 = arith.constant 0 : index
    %195 = vector.load %arg7[%c1_84, %c0_85, %c0_86] : memref<2x1x32xf32, #tpu.memory_space<vmem>>, vector<1x1x32xf32>
    %196 = vector.shape_cast %195 : vector<1x1x32xf32> to vector<1x32xf32>
    %197 = vector.broadcast %196 : vector<1x32xf32> to vector<16x32xf32>
    %198 = arith.addf %194, %197 : vector<16x32xf32>
    %199 = arith.addf %152, %198 : vector<16x32xf32>
    %c1_87 = arith.constant 1 : index
    %c0_88 = arith.constant 0 : index
    %c0_89 = arith.constant 0 : index
    %200 = vector.load %arg8[%c1_87, %c0_88, %c0_89] : memref<2x1x32xf32, #tpu.memory_space<vmem>>, vector<1x1x32xf32>
    %201 = vector.shape_cast %200 : vector<1x1x32xf32> to vector<1x32xf32>
    %c1_90 = arith.constant 1 : index
    %c0_91 = arith.constant 0 : index
    %c0_92 = arith.constant 0 : index
    %202 = vector.load %arg9[%c1_90, %c0_91, %c0_92] : memref<2x1x32xf32, #tpu.memory_space<vmem>>, vector<1x1x32xf32>
    %203 = vector.shape_cast %202 : vector<1x1x32xf32> to vector<1x32xf32>
    %cst_93 = arith.constant dense<0.000000e+00> : vector<16xf32>
    %204 = vector.multi_reduction <add>, %199, %cst_93 [1] : vector<16x32xf32> to vector<16xf32>
    %205 = vector.shape_cast %204 : vector<16xf32> to vector<16x1xf32>
    %cst_94 = arith.constant 3.200000e+01 : f32
    %206 = vector.broadcast %cst_94 : f32 to vector<16x1xf32>
    %207 = arith.divf %205, %206 : vector<16x1xf32>
    %208 = arith.mulf %199, %199 : vector<16x32xf32>
    %cst_95 = arith.constant dense<0.000000e+00> : vector<16xf32>
    %209 = vector.multi_reduction <add>, %208, %cst_95 [1] : vector<16x32xf32> to vector<16xf32>
    %210 = vector.shape_cast %209 : vector<16xf32> to vector<16x1xf32>
    %cst_96 = arith.constant 3.200000e+01 : f32
    %211 = vector.broadcast %cst_96 : f32 to vector<16x1xf32>
    %212 = arith.divf %210, %211 : vector<16x1xf32>
    %213 = arith.mulf %207, %207 : vector<16x1xf32>
    %214 = arith.subf %212, %213 : vector<16x1xf32>
    %215 = vector.broadcast %207 : vector<16x1xf32> to vector<16x32xf32>
    %216 = arith.subf %199, %215 : vector<16x32xf32>
    %cst_97 = arith.constant 9.99999996E-13 : f32
    %217 = vector.broadcast %cst_97 : f32 to vector<16x1xf32>
    %218 = arith.addf %214, %217 : vector<16x1xf32>
    %219 = math.rsqrt %218 : vector<16x1xf32>
    %220 = vector.broadcast %219 : vector<16x1xf32> to vector<16x32xf32>
    %221 = arith.mulf %216, %220 : vector<16x32xf32>
    %222 = vector.broadcast %201 : vector<1x32xf32> to vector<16x32xf32>
    %223 = arith.mulf %221, %222 : vector<16x32xf32>
    %224 = vector.broadcast %203 : vector<1x32xf32> to vector<16x32xf32>
    %225 = arith.addf %223, %224 : vector<16x32xf32>
    %c1_98 = arith.constant 1 : index
    %c0_99 = arith.constant 0 : index
    %c0_100 = arith.constant 0 : index
    %226 = vector.load %arg10[%c1_98, %c0_99, %c0_100] : memref<2x32x64xf32, #tpu.memory_space<vmem>>, vector<1x32x64xf32>
    %227 = vector.shape_cast %226 : vector<1x32x64xf32> to vector<32x64xf32>
    %cst_101 = arith.constant dense<0.000000e+00> : vector<16x64xf32>
    %228 = tpu.matmul %225, %227, %cst_101 {dimension_numbers = #tpu.dot_dimension_numbers<[1], [0], [0], [1], [0, 0, 1, 1], [], []>} : vector<16x32xf32>, vector<32x64xf32>, vector<16x64xf32> -> vector<16x64xf32>
    %c1_102 = arith.constant 1 : index
    %c0_103 = arith.constant 0 : index
    %c0_104 = arith.constant 0 : index
    %229 = vector.load %arg11[%c1_102, %c0_103, %c0_104] : memref<2x1x64xf32, #tpu.memory_space<vmem>>, vector<1x1x64xf32>
    %230 = vector.shape_cast %229 : vector<1x1x64xf32> to vector<1x64xf32>
    %231 = vector.broadcast %230 : vector<1x64xf32> to vector<16x64xf32>
    %232 = arith.addf %228, %231 : vector<16x64xf32>
    %233 = arith.mulf %232, %232 : vector<16x64xf32>
    %234 = arith.mulf %232, %233 : vector<16x64xf32>
    %cst_105 = arith.constant 4.471500e-02 : f32
    %235 = vector.broadcast %cst_105 : f32 to vector<16x64xf32>
    %236 = arith.mulf %235, %234 : vector<16x64xf32>
    %237 = arith.addf %232, %236 : vector<16x64xf32>
    %cst_106 = arith.constant 0.797884583 : f32
    %238 = vector.broadcast %cst_106 : f32 to vector<16x64xf32>
    %239 = arith.mulf %238, %237 : vector<16x64xf32>
    %240 = math.tanh %239 : vector<16x64xf32>
    %cst_107 = arith.constant 1.000000e+00 : f32
    %241 = vector.broadcast %cst_107 : f32 to vector<16x64xf32>
    %242 = arith.addf %241, %240 : vector<16x64xf32>
    %cst_108 = arith.constant 5.000000e-01 : f32
    %243 = vector.broadcast %cst_108 : f32 to vector<16x64xf32>
    %244 = arith.mulf %243, %242 : vector<16x64xf32>
    %245 = arith.mulf %232, %244 : vector<16x64xf32>
    %c1_109 = arith.constant 1 : index
    %c0_110 = arith.constant 0 : index
    %c0_111 = arith.constant 0 : index
    %246 = vector.load %arg12[%c1_109, %c0_110, %c0_111] : memref<2x64x32xf32, #tpu.memory_space<vmem>>, vector<1x64x32xf32>
    %247 = vector.shape_cast %246 : vector<1x64x32xf32> to vector<64x32xf32>
    %cst_112 = arith.constant dense<0.000000e+00> : vector<16x32xf32>
    %248 = tpu.matmul %245, %247, %cst_112 {dimension_numbers = #tpu.dot_dimension_numbers<[1], [0], [0], [1], [0, 0, 1, 1], [], []>} : vector<16x64xf32>, vector<64x32xf32>, vector<16x32xf32> -> vector<16x32xf32>
    %c1_113 = arith.constant 1 : index
    %c0_114 = arith.constant 0 : index
    %c0_115 = arith.constant 0 : index
    %249 = vector.load %arg13[%c1_113, %c0_114, %c0_115] : memref<2x1x32xf32, #tpu.memory_space<vmem>>, vector<1x1x32xf32>
    %250 = vector.shape_cast %249 : vector<1x1x32xf32> to vector<1x32xf32>
    %251 = vector.broadcast %250 : vector<1x32xf32> to vector<16x32xf32>
    %252 = arith.addf %248, %251 : vector<16x32xf32>
    %253 = arith.addf %225, %252 : vector<16x32xf32>
    %c1_116 = arith.constant 1 : index
    %c0_117 = arith.constant 0 : index
    %c0_118 = arith.constant 0 : index
    %254 = vector.load %arg14[%c1_116, %c0_117, %c0_118] : memref<2x1x32xf32, #tpu.memory_space<vmem>>, vector<1x1x32xf32>
    %255 = vector.shape_cast %254 : vector<1x1x32xf32> to vector<1x32xf32>
    %c1_119 = arith.constant 1 : index
    %c0_120 = arith.constant 0 : index
    %c0_121 = arith.constant 0 : index
    %256 = vector.load %arg15[%c1_119, %c0_120, %c0_121] : memref<2x1x32xf32, #tpu.memory_space<vmem>>, vector<1x1x32xf32>
    %257 = vector.shape_cast %256 : vector<1x1x32xf32> to vector<1x32xf32>
    %cst_122 = arith.constant dense<0.000000e+00> : vector<16xf32>
    %258 = vector.multi_reduction <add>, %253, %cst_122 [1] : vector<16x32xf32> to vector<16xf32>
    %259 = vector.shape_cast %258 : vector<16xf32> to vector<16x1xf32>
    %cst_123 = arith.constant 3.200000e+01 : f32
    %260 = vector.broadcast %cst_123 : f32 to vector<16x1xf32>
    %261 = arith.divf %259, %260 : vector<16x1xf32>
    %262 = arith.mulf %253, %253 : vector<16x32xf32>
    %cst_124 = arith.constant dense<0.000000e+00> : vector<16xf32>
    %263 = vector.multi_reduction <add>, %262, %cst_124 [1] : vector<16x32xf32> to vector<16xf32>
    %264 = vector.shape_cast %263 : vector<16xf32> to vector<16x1xf32>
    %cst_125 = arith.constant 3.200000e+01 : f32
    %265 = vector.broadcast %cst_125 : f32 to vector<16x1xf32>
    %266 = arith.divf %264, %265 : vector<16x1xf32>
    %267 = arith.mulf %261, %261 : vector<16x1xf32>
    %268 = arith.subf %266, %267 : vector<16x1xf32>
    %269 = vector.broadcast %261 : vector<16x1xf32> to vector<16x32xf32>
    %270 = arith.subf %253, %269 : vector<16x32xf32>
    %cst_126 = arith.constant 9.99999996E-13 : f32
    %271 = vector.broadcast %cst_126 : f32 to vector<16x1xf32>
    %272 = arith.addf %268, %271 : vector<16x1xf32>
    %273 = math.rsqrt %272 : vector<16x1xf32>
    %274 = vector.broadcast %273 : vector<16x1xf32> to vector<16x32xf32>
    %275 = arith.mulf %270, %274 : vector<16x32xf32>
    %276 = vector.broadcast %255 : vector<1x32xf32> to vector<16x32xf32>
    %277 = arith.mulf %275, %276 : vector<16x32xf32>
    %278 = vector.broadcast %257 : vector<1x32xf32> to vector<16x32xf32>
    %279 = arith.addf %277, %278 : vector<16x32xf32>
    %c0_127 = arith.constant 0 : index
    %c0_128 = arith.constant 0 : index
    %280 = vector.load %arg16[%c0_127, %c0_128] : memref<32x32xf32, #tpu.memory_space<vmem>>, vector<32x32xf32>
    %cst_129 = arith.constant dense<0.000000e+00> : vector<16x32xf32>
    %281 = tpu.matmul %279, %280, %cst_129 {dimension_numbers = #tpu.dot_dimension_numbers<[1], [0], [0], [1], [0, 0, 1, 1], [], []>} : vector<16x32xf32>, vector<32x32xf32>, vector<16x32xf32> -> vector<16x32xf32>
    %c0_130 = arith.constant 0 : index
    %c0_131 = arith.constant 0 : index
    %282 = vector.load %arg17[%c0_130, %c0_131] : memref<1x32xf32, #tpu.memory_space<vmem>>, vector<1x32xf32>
    %283 = vector.broadcast %282 : vector<1x32xf32> to vector<16x32xf32>
    %284 = arith.addf %281, %283 : vector<16x32xf32>
    %285 = arith.mulf %284, %284 : vector<16x32xf32>
    %286 = arith.mulf %284, %285 : vector<16x32xf32>
    %cst_132 = arith.constant 4.471500e-02 : f32
    %287 = vector.broadcast %cst_132 : f32 to vector<16x32xf32>
    %288 = arith.mulf %287, %286 : vector<16x32xf32>
    %289 = arith.addf %284, %288 : vector<16x32xf32>
    %cst_133 = arith.constant 0.797884583 : f32
    %290 = vector.broadcast %cst_133 : f32 to vector<16x32xf32>
    %291 = arith.mulf %290, %289 : vector<16x32xf32>
    %292 = math.tanh %291 : vector<16x32xf32>
    %cst_134 = arith.constant 1.000000e+00 : f32
    %293 = vector.broadcast %cst_134 : f32 to vector<16x32xf32>
    %294 = arith.addf %293, %292 : vector<16x32xf32>
    %cst_135 = arith.constant 5.000000e-01 : f32
    %295 = vector.broadcast %cst_135 : f32 to vector<16x32xf32>
    %296 = arith.mulf %295, %294 : vector<16x32xf32>
    %297 = arith.mulf %284, %296 : vector<16x32xf32>
    %c0_136 = arith.constant 0 : index
    %c0_137 = arith.constant 0 : index
    %298 = vector.load %arg18[%c0_136, %c0_137] : memref<1x32xf32, #tpu.memory_space<vmem>>, vector<1x32xf32>
    %c0_138 = arith.constant 0 : index
    %c0_139 = arith.constant 0 : index
    %299 = vector.load %arg19[%c0_138, %c0_139] : memref<1x32xf32, #tpu.memory_space<vmem>>, vector<1x32xf32>
    %cst_140 = arith.constant dense<0.000000e+00> : vector<16xf32>
    %300 = vector.multi_reduction <add>, %297, %cst_140 [1] : vector<16x32xf32> to vector<16xf32>
    %301 = vector.shape_cast %300 : vector<16xf32> to vector<16x1xf32>
    %cst_141 = arith.constant 3.200000e+01 : f32
    %302 = vector.broadcast %cst_141 : f32 to vector<16x1xf32>
    %303 = arith.divf %301, %302 : vector<16x1xf32>
    %304 = arith.mulf %297, %297 : vector<16x32xf32>
    %cst_142 = arith.constant dense<0.000000e+00> : vector<16xf32>
    %305 = vector.multi_reduction <add>, %304, %cst_142 [1] : vector<16x32xf32> to vector<16xf32>
    %306 = vector.shape_cast %305 : vector<16xf32> to vector<16x1xf32>
    %cst_143 = arith.constant 3.200000e+01 : f32
    %307 = vector.broadcast %cst_143 : f32 to vector<16x1xf32>
    %308 = arith.divf %306, %307 : vector<16x1xf32>
    %309 = arith.mulf %303, %303 : vector<16x1xf32>
    %310 = arith.subf %308, %309 : vector<16x1xf32>
    %311 = vector.broadcast %303 : vector<16x1xf32> to vector<16x32xf32>
    %312 = arith.subf %297, %311 : vector<16x32xf32>
    %cst_144 = arith.constant 9.99999996E-13 : f32
    %313 = vector.broadcast %cst_144 : f32 to vector<16x1xf32>
    %314 = arith.addf %310, %313 : vector<16x1xf32>
    %315 = math.rsqrt %314 : vector<16x1xf32>
    %316 = vector.broadcast %315 : vector<16x1xf32> to vector<16x32xf32>
    %317 = arith.mulf %312, %316 : vector<16x32xf32>
    %318 = vector.broadcast %298 : vector<1x32xf32> to vector<16x32xf32>
    %319 = arith.mulf %317, %318 : vector<16x32xf32>
    %320 = vector.broadcast %299 : vector<1x32xf32> to vector<16x32xf32>
    %321 = arith.addf %319, %320 : vector<16x32xf32>
    %c0_145 = arith.constant 0 : index
    %c0_146 = arith.constant 0 : index
    %322 = vector.load %arg20[%c0_145, %c0_146] : memref<32x512xf32, #tpu.memory_space<vmem>>, vector<32x512xf32>
    %cst_147 = arith.constant dense<0.000000e+00> : vector<16x512xf32>
    %323 = tpu.matmul %321, %322, %cst_147 {dimension_numbers = #tpu.dot_dimension_numbers<[1], [0], [0], [1], [0, 0, 1, 1], [], []>} : vector<16x32xf32>, vector<32x512xf32>, vector<16x512xf32> -> vector<16x512xf32>
    %c0_148 = arith.constant 0 : index
    %c0_149 = arith.constant 0 : index
    %324 = vector.load %arg21[%c0_148, %c0_149] : memref<1x512xf32, #tpu.memory_space<vmem>>, vector<1x512xf32>
    %325 = vector.broadcast %324 : vector<1x512xf32> to vector<16x512xf32>
    %326 = arith.addf %323, %325 : vector<16x512xf32>
    %c0_150 = arith.constant 0 : index
    %c0_151 = arith.constant 0 : index
    %327 = vector.load %arg22[%c0_150, %c0_151] : memref<16x512xf32, #tpu.memory_space<vmem>>, vector<16x512xf32>
    tpu.vector_store %arg22[%c0_150, %c0_151], %326 {strides = array<i32>} : memref<16x512xf32, #tpu.memory_space<vmem>>, vector<16x512xf32>,
    return
  }
}

</mosaic_0001>

<bundles_post_ra>
// kernel: pte_model_forward.1
= control target key start
LH: loop header
LB: loop body
LE: loop exit
PB: predicated region body
PF: predicated region fallthrough
CT: control target
= control target key end

     0   :  { %s4082_s0 = inlined_call_operand.vmem [shape: f32[16,32], index: 0, kind: input, shape index: {}]   ;;  %s4083_s1 = inlined_call_operand.vmem [shape: f32[4,8,8], index: 1, kind: input, shape index: {}]   ;;  %s4084_s2 = inlined_call_operand.vmem [shape: f32[1,32], index: 2, kind: input, shape index: {}]   ;;  %s4085_s3 = inlined_call_operand.vmem [shape: f32[1,32], index: 3, kind: input, shape index: {}]   ;;  %s4086_s4 = inlined_call_operand.vmem [shape: f32[2,32,96], index: 4, kind: input, shape index: {}]   ;;  %s4087_s5 = inlined_call_operand.vmem [shape: f32[2,1,96], index: 5, kind: input, shape index: {}]   ;;  %s4088_s6 = inlined_call_operand.vmem [shape: f32[2,32,32], index: 6, kind: input, shape index: {}]   ;;  %s4089_s7 = inlined_call_operand.vmem [shape: f32[2,1,32], index: 7, kind: input, shape index: {}]   ;;  %s4090_s8 = inlined_call_operand.vmem [shape: f32[2,1,32], index: 8, kind: input, shape index: {}]   ;;  %s4091_s9 = inlined_call_operand.vmem [shape: f32[2,1,32], index: 9, kind: input, shape index: {}]   ;;  %s4092_s10 = inlined_call_operand.vmem [shape: f32[2,32,64], index: 10, kind: input, shape index: {}]   ;;  %s4093_s11 = inlined_call_operand.vmem [shape: f32[2,1,64], index: 11, kind: input, shape index: {}]   ;;  %s4094_s12 = inlined_call_operand.vmem [shape: f32[2,64,32], index: 12, kind: input, shape index: {}]   ;;  %s4095_s13 = inlined_call_operand.vmem [shape: f32[2,1,32], index: 13, kind: input, shape index: {}]   ;;  %s4096_s14 = inlined_call_operand.vmem [shape: f32[2,1,32], index: 14, kind: input, shape index: {}]   ;;  %s4097_s15 = inlined_call_operand.vmem [shape: f32[2,1,32], index: 15, kind: input, shape index: {}]   ;;  %s4098_s16 = inlined_call_operand.vmem [shape: f32[32,32], index: 16, kind: input, shape index: {}]   ;;  %s4099_s17 = inlined_call_operand.vmem [shape: f32[1,32], index: 17, kind: input, shape index: {}]   ;;  %s4100_s18 = inlined_call_operand.vmem [shape: f32[1,32], index: 18, kind: input, shape index: {}]   ;;  %s4101_s19 = inlined_call_operand.vmem [shape: f32[1,32], index: 19, kind: input, shape index: {}]   ;;  %s4102_s20 = inlined_call_operand.vmem [shape: f32[32,512], index: 20, kind: input, shape index: {}]   ;;  %s4103_s21 = inlined_call_operand.vmem [shape: f32[1,512], index: 21, kind: input, shape index: {}]   ;;  %s4104_s22 = inlined_call_operand.hbm [shape: f32[16,512], index: 22, kind: output, shape index: {}]  }
   0x1   :  { %4110 = sst [smem:[#allocation5_spill]] %s4082_s0 }
   0x2   :  { %4111 = sst [smem:[#allocation6_spill]] %s4083_s1 }
   0x3   :  { %4112 = sst [smem:[#allocation7_spill]] %s4084_s2 }
   0x4   :  { %4113 = sst [smem:[#allocation8_spill]] %s4085_s3 }
   0x5   :  { %4114 = sst [smem:[#allocation9_spill]] %s4086_s4 }
   0x6   :  { %4115 = sst [smem:[#allocation10_spill]] %s4087_s5 }
   0x7   :  { %4116 = sst [smem:[#allocation11_spill]] %s4088_s6 }
   0x8   :  { %s4117_s29 = sld [smem:[#allocation5_spill]]  ;;  %vm80_vm0 = vcmask 261120  }
   0xe   :  { %v76_v0 = vld [vmem:[%s4117_s29] sm:$0xff]  ;;  %v77_v1 = vld [vmem:[%s4117_s29 + $0x8] sm:$0xff] }
   0xf   :  { %27 = vsyncpa [#allocation3], 0  ;;  %v81_v2 = vsel %vm80_vm0, %v76_v0, 0.0  ;;  %v90_v3 = vmul.f32 %v76_v0, %v76_v0  ;;  %v91_v4 = vmul.f32 %v77_v1, %v77_v1  ;;  %v84_v6 = vsel %vm80_vm0, %v77_v1, 0.0  ;;  %s4118_s1 = sld [smem:[#allocation9_spill]]  ;;  %s4119_s28 = sld [smem:[#allocation7_spill]] }
  0x10   :  { %82 = vadd.xlane.f32.xlu0 %v81_v2  ;;  %s4120_s4 = sld [smem:[#allocation8_spill]]  ;;  %v3428_v40 = vmov 0.0   ;;  %vm3429_vm1 = vmmov 0   ;;  %s4121_s5 = sld [smem:[#allocation10_spill]]  ;;  %vm228_vm2 = vcmask 130048   ;;  %vm531_vm3 = vcmask 64512  }
  0x11   :  { %v92_v5 = vsel %vm80_vm0, %v90_v3, 0.0  ;;  %v95_v7 = vsel %vm80_vm0, %v91_v4, 0.0  ;;  %3039 = vmatprep.subr.mxu1 %v3428_v40  ;;  %3041 = vmatprep.mubr.msk.f32.mxu1 %vm3429_vm1, %v3428_v40  ;;  %s3430_s24 = smov 112   ;;  %s3431_s6 = smov 96   ;;  %vm1157_vm4 = vcmask 523264  }
  0x12   :  { %93 = vadd.xlane.f32.xlu1 %v92_v5  ;;  %s4122_s2 = sld [smem:[#allocation6_spill]]  ;;  %s3432_s0 = smov 64  }
  0x13   :  { %s4123_s26 = sld [smem:[#allocation11_spill]] }
  0x14   :  { %85 = vadd.xlane.f32.xlu0 %v84_v6 }
  0x15   :  { %v128_v8 = vld [vmem:[%s4118_s1] sm:$0xff]  ;;  %v129_v9 = vld [vmem:[%s4118_s1 + $0x8] sm:$0xff]  ;;  %v130_v10 = vld [vmem:[%s4118_s1 + $0x10] sm:$0xff] }
  0x16   :  { %96 = vadd.xlane.f32.xlu1 %v95_v7  ;;  %v3223_v11 = vpack.c.bf16 %v129_v9, %v128_v8  ;;  %v131_v12 = vld [vmem:[%s4118_s1 + $0x18] sm:$0xff]  ;;  %v2839_v30 = vld [vmem:[%s4119_s28] ss:$0 sm:$0xff] }
  0x17   :  { %v3227_v13 = vpack.c.bf16 %v131_v12, %v130_v10  ;;  %v2840_v32 = vld [vmem:[%s4120_s4] ss:$0 sm:$0xff]  ;;  %s3433_s4 = smov 16  }
  0x18   :  { %3224 = vmatprep.subr.bf16.mxu0 %v3223_v11  ;;  %v2841_v41 = vld [vmem:[%s4121_s5] ss:$0 sm:$0xff]  ;;  %v3650_v56 = vld [vmem:[%s4122_s2 + $0x8] sm:$0xff]  ;;  %v3658_v62 = vld [vmem:[%s4122_s2 + $0x10] sm:$0xff] }
  0x19   :  { %3226 = vmatpush3.bf16.msra.mxu0 %v3223_v11  ;;  %v3644_v52 = vld [vmem:[%s4122_s2] sm:$0xff]  ;;  %v3664_v2 = vld [vmem:[%s4122_s2 + $0x18] sm:$0xff] }
  0x1a   :  { %3228 = vmatprep.subr.bf16.mxu0 %v3227_v13 }
  0x1d   :  { %3230 = vmatpush3.bf16.msra.mxu0 %v3227_v13 }
  0x1e   :  { %3059 = vmatprep.subr.mxu0 %v3428_v40 }
  0x9d   :  { %v83_v14 = vpop.xlane.xlu0 %82 }
  0x9e   :  { %v88_v15 = vmul.f32 0.03125, %v83_v14 }
  0x9f   :  { %v94_v16 = vpop.xlane.xlu1 %93 }
  0xa0   :  { %v100_v17 = vmul.f32 %v88_v15, %v88_v15  ;;  %v98_v18 = vmul.f32 0.03125, %v94_v16  ;;  %v104_v28 = vsub.f32 %v76_v0, %v88_v15 }
  0xa1   :  { %v86_v19 = vpop.xlane.xlu0 %85 }
  0xa2   :  { %v102_v20 = vsub.f32 %v98_v18, %v100_v17  ;;  %v89_v21 = vmul.f32 0.03125, %v86_v19 }
  0xa3   :  { %v97_v22 = vpop.xlane.xlu1 %96 }
  0xa4   :  { %v106_v23 = vadd.f32 1e-12, %v102_v20  ;;  %v101_v24 = vmul.f32 %v89_v21, %v89_v21  ;;  %v99_v25 = vmul.f32 0.03125, %v97_v22  ;;  %v105_v33 = vsub.f32 %v77_v1, %v89_v21 }
  0xa6   :  { %3336 = vrsqrt.f32 %v106_v23  ;;  %v103_v26 = vsub.f32 %v99_v25, %v101_v24 }
  0xa8   :  { %v107_v27 = vadd.f32 1e-12, %v103_v26 }
  0xaa   :  { %3338 = vrsqrt.f32 %v107_v27 }
  0xb0   :  { %v3337_v29 = vpop.eup %3336 }
  0xb1   :  { %v110_v31 = vmul.f32 %v3337_v29, %v104_v28 }
  0xb3   :  { %v118_v34 = vmul.f32 %v2839_v30, %v110_v31 }
  0xb4   :  { %v3339_v35 = vpop.eup %3338 }
  0xb5   :  { %v111_v36 = vmul.f32 %v3339_v35, %v105_v33  ;;  %v3580_v37 = vadd.f32 %v2840_v32, %v118_v34 }
  0xb7   :  { %v119_v38 = vmul.f32 %v2839_v30, %v111_v36  ;;  %3036 = vmatprep.mubr.msk.f32.mxu0 %vm80_vm0, %v3580_v37 }
  0xb9   :  { %v3584_v39 = vadd.f32 %v2840_v32, %v119_v38 }
  0xbb   :  { %3037 = vmatmul.mubr.msk.f32.vlgmr.msra.gmra.mrb[0].mxu0 %vm80_vm0, %v3584_v39 }
  0xbc   :  { %3061 = vmatprep.mubr.msk.f32.mxu0 %vm3429_vm1, %v3428_v40 }
 0x18e   :  { %v3038_v42 = vpop.f32.mrb[0].mxu0 }
 0x18f   :  { %v3597_v43 = vadd.f32 %v3038_v42, %v2841_v41  ;;  %v211_v44 = vpop.f32.mrb[1].mxu0 }
 0x190   :  { %v3599_v45 = vadd.f32 %v2841_v41, %v211_v44 }
 0x191   :  { %224 = vrot.lane.b32.xlu1 %v3597_v43, %s3430_s24 }
 0x192   :  { %222 = vrot.lane.b32.xlu0 %v3599_v45, %s3430_s24 }
 0x195   :  { %226 = vrot.lane.b32.xlu1 %v3599_v45, %s3431_s6 }
 0x199   :  { %303 = vrot.lane.b32.xlu1 %v3597_v43, %s3431_s6 }
 0x203   :  { %v3609_v46 = vpop.permute.xlu1 %224 }
 0x204   :  { %455 = vrot.lane.b32.xlu1 %v3609_v46, %s3431_s6  ;;  %v3613_v47 = vpop.permute.xlu0 %222 }
 0x205   :  { %379 = vrot.lane.b32.xlu0 %v3613_v47, %s3431_s6 }
 0x207   :  { %v227_v48 = vpop.permute.xlu1 %226 }
 0x208   :  { %3040 = vmatpush3.xpose.msk.msra.mxu1 %vm228_vm2, %v227_v48  ;;  %v891_v48 = vld [vmem:[%s4123_s26 + $0x8] sm:$0xff] }
 0x209   :  { %3044 = vmatprep.subr.mxu1 %v3428_v40 }
 0x20b   :  { %3042 = vmatmul.mubr.msk.f32.vlgmr.msra.gmra.mrb[0].mxu1 %vm228_vm2, %v3599_v45  ;;  %v304_v49 = vpop.permute.xlu1 %303 }
 0x20c   :  { %3045 = vmatpush3.xpose.msk.msra.mxu1 %vm228_vm2, %v304_v49  ;;  %3046 = vmatprep.mubr.msk.f32.mxu1 %vm3429_vm1, %v3428_v40 }
 0x20d   :  { %3049 = vmatprep.subr.mxu1 %v3428_v40 }
 0x20f   :  { %3047 = vmatmul.mubr.msk.f32.vlgmr.msra.gmra.mrb[2].mxu1 %vm228_vm2, %v3597_v43 }
 0x210   :  { %3051 = vmatprep.mubr.msk.f32.mxu1 %vm3429_vm1, %v3428_v40 }
 0x276   :  { %v456_v51 = vpop.permute.xlu1 %455 }
 0x277   :  { %v380_v50 = vpop.permute.xlu0 %379 }
 0x278   :  { %3050 = vmatpush3.xpose.msk.msra.mxu1 %vm228_vm2, %v380_v50 }
 0x279   :  { %3054 = vmatprep.subr.mxu1 %v3428_v40 }
 0x27b   :  { %3052 = vmatmul.mubr.msk.f32.vlgmr.msra.gmra.mrb[4].mxu1 %vm228_vm2, %v3613_v47 }
 0x27c   :  { %3055 = vmatpush3.xpose.msk.msra.mxu1 %vm228_vm2, %v456_v51  ;;  %3056 = vmatprep.mubr.msk.f32.mxu1 %vm3429_vm1, %v3428_v40 }
 0x27d   :  { %3064 = vmatprep.subr.mxu1 %v3428_v40 }
 0x27f   :  { %3057 = vmatmul.mubr.msk.f32.vlgmr.msra.gmra.mrb[6].mxu1 %vm228_vm2, %v3609_v46 }
 0x280   :  { %3066 = vmatprep.mubr.msk.f32.mxu1 %vm3429_vm1, %v3428_v40 }
 0x2de   :  { %v299_v53 = vpop.f32.mrb[0].mxu1 }
 0x2df   :  { %v300_v54 = vadd.f32 %v299_v53, %v3644_v52  ;;  %v3043_v55 = vpop.f32.mrb[1].mxu1  ;;  %v892_v53 = vld [vmem:[%s4123_s26 + $0x10] sm:$0xff] }
 0x2e1   :  { %v532_v57 = vsel %vm531_vm3, %v300_v54, -inf }
 0x2e2   :  { %v375_v58 = vpop.f32.mrb[2].mxu1  ;;  %533 = vmax.xlane.f32.xlu0 %v532_v57 }
 0x2e3   :  { %v376_v59 = vadd.f32 %v375_v58, %v3650_v56  ;;  %v3048_v60 = vpop.f32.mrb[3].mxu1 }
 0x2e5   :  { %v535_v61 = vsel %vm531_vm3, %v376_v59, -inf }
 0x2e6   :  { %536 = vmax.xlane.f32.xlu1 %v535_v61 }
 0x34e   :  { %v451_v63 = vpop.f32.mrb[4].mxu1 }
 0x34f   :  { %v452_v0 = vadd.f32 %v451_v63, %v3658_v62  ;;  %v3053_v1 = vpop.f32.mrb[5].mxu1 }
 0x351   :  { %v538_v3 = vsel %vm531_vm3, %v452_v0, -inf }
 0x352   :  { %v527_v4 = vpop.f32.mrb[6].mxu1  ;;  %539 = vmax.xlane.f32.xlu0 %v538_v3 }
 0x353   :  { %v528_v5 = vadd.f32 %v527_v4, %v3664_v2  ;;  %v3058_v6 = vpop.f32.mrb[7].mxu1 }
 0x355   :  { %v541_v7 = vsel %vm531_vm3, %v528_v5, -inf }
 0x356   :  { %542 = vmax.xlane.f32.xlu0 %v541_v7 }
 0x36f   :  { %v534_v8 = vpop.xlane.xlu0 %533 }
 0x370   :  { %v544_v9 = vsub.f32 %v300_v54, %v534_v8  ;;  %v893_v54 = vld [vmem:[%s4123_s26 + $0x18] sm:$0xff] }
 0x371   :  { %v3235_v55 = vpack.c.bf16 %v893_v54, %v892_v53  ;;  %v1143_v53 = vld [vmem:[%s4094_s12 + $0x8] sm:$0xff] }
 0x372   :  { %v548_v10 = vmul.f32 1.442695, %v544_v9 }
 0x373   :  { %v537_v11 = vpop.xlane.xlu1 %536 }
 0x374   :  { %3340 = vpow2.f32 %v548_v10  ;;  %v545_v12 = vsub.f32 %v376_v59, %v537_v11 }
 0x376   :  { %v550_v13 = vmul.f32 1.442695, %v545_v12 }
 0x378   :  { %3342 = vpow2.f32 %v550_v13 }
 0x37e   :  { %v3341_v14 = vpop.eup %3340 }
 0x37f   :  { %v556_v15 = vsel %vm531_vm3, %v3341_v14, 0.0 }
 0x380   :  { %557 = vadd.xlane.f32.xlu0 %v556_v15 }
 0x382   :  { %v3343_v16 = vpop.eup %3342 }
 0x383   :  { %v559_v17 = vsel %vm531_vm3, %v3343_v16, 0.0 }
 0x384   :  { %560 = vadd.xlane.f32.xlu1 %v559_v17 }
 0x395   :  { %652 = vrot.lane.b32.xlu1 %v3597_v43, %s3432_s0 }
 0x399   :  { %728 = vrot.lane.b32.xlu1 %v3613_v47, %s3432_s0  ;;  %v890_v47 = vld [vmem:[%s4123_s26] sm:$0xff] }
 0x39a   :  { %v3231_v49 = vpack.c.bf16 %v891_v48, %v890_v47 }
 0x3df   :  { %v540_v18 = vpop.xlane.xlu0 %539 }
 0x3e0   :  { %v546_v19 = vsub.f32 %v452_v0, %v540_v18  ;;  %v1034_v18 = vld [vmem:[%s4092_s10 + $0x10] sm:$0xff] }
 0x3e2   :  { %v552_v20 = vmul.f32 1.442695, %v546_v19 }
 0x3e3   :  { %v543_v21 = vpop.xlane.xlu0 %542 }
 0x3e4   :  { %3344 = vpow2.f32 %v552_v20  ;;  %v547_v22 = vsub.f32 %v528_v5, %v543_v21  ;;  %v2856_v5 = vld [vmem:[%s4089_s7] ss:$0 sm:$0xff]  ;;  %v1035_v20 = vld [vmem:[%s4092_s10 + $0x18] sm:$0xff] }
 0x3e5   :  { %v3243_v21 = vpack.c.bf16 %v1035_v20, %v1034_v18 }
 0x3e6   :  { %v554_v23 = vmul.f32 1.442695, %v547_v22 }
 0x3e8   :  { %3346 = vpow2.f32 %v554_v23 }
 0x3ee   :  { %v3345_v24 = vpop.eup %3344 }
 0x3ef   :  { %v562_v25 = vsel %vm531_vm3, %v3345_v24, 0.0 }
 0x3f0   :  { %563 = vadd.xlane.f32.xlu0 %v562_v25 }
 0x3f2   :  { %v3347_v26 = vpop.eup %3346 }
 0x3f3   :  { %v565_v27 = vsel %vm531_vm3, %v3347_v26, 0.0 }
 0x3f4   :  { %566 = vadd.xlane.f32.xlu1 %v565_v27 }
 0x405   :  { %804 = vrot.lane.b32.xlu1 %v3609_v46, %s3432_s0 }
 0x406   :  { %576 = vrot.lane.b32.xlu0 %v3599_v45, %s3432_s0 }
 0x40d   :  { %v558_v32 = vpop.xlane.xlu0 %557 }
 0x411   :  { %v561_v28 = vpop.xlane.xlu1 %560 }
 0x412   :  { %3348 = vrcp.f32 %v561_v28 }
 0x413   :  { %3350 = vrcp.f32 %v558_v32 }
 0x415   :  { %v653_v29 = vpop.permute.xlu1 %652 }
 0x416   :  { %3065 = vmatpush3.msra.mxu1 %v653_v29 }
 0x417   :  { %3074 = vmatprep.subr.mxu1 %v3428_v40 }
 0x419   :  { %v729_v33 = vpop.permute.xlu1 %728 }
 0x41c   :  { %v3349_v30 = vpop.eup %3348 }
 0x41d   :  { %v573_v31 = vmul.f32 %v3349_v30, %v3343_v16  ;;  %v3351_v35 = vpop.eup %3350 }
 0x41e   :  { %v572_v36 = vmul.f32 %v3351_v35, %v3341_v14 }
 0x41f   :  { %3067 = vmatmul.mubr.msk.f32.vlgmr.msra.gmra.mrb[8].mxu1 %vm531_vm3, %v573_v31 }
 0x420   :  { %3076 = vmatprep.mubr.msk.f32.mxu1 %vm3429_vm1, %v3428_v40 }
 0x47d   :  { %v564_v34 = vpop.xlane.xlu0 %563 }
 0x47e   :  { %3352 = vrcp.f32 %v564_v34 }
 0x481   :  { %v567_v38 = vpop.xlane.xlu1 %566  ;;  %v577_v41 = vpop.permute.xlu0 %576 }
 0x482   :  { %3354 = vrcp.f32 %v567_v38  ;;  %3060 = vmatpush3.msra.mxu0 %v577_v41  ;;  %v2859_v41 = vld [vmem:[%s4090_s8] ss:$0 sm:$0xff] }
 0x483   :  { %3062 = vmatmul.mubr.msk.f32.vlgmr.msra.gmra.mrb[2].mxu0 %vm531_vm3, %v572_v36  ;;  %3069 = vmatprep.subr.mxu0 %v3428_v40 }
 0x484   :  { %3070 = vmatpush3.msra.mxu0 %v729_v33  ;;  %3071 = vmatprep.mubr.msk.f32.mxu0 %vm3429_vm1, %v3428_v40 }
 0x485   :  { %v805_v42 = vpop.permute.xlu1 %804  ;;  %3232 = vmatprep.subr.bf16.mxu0 %v3231_v49 }
 0x486   :  { %3075 = vmatpush3.msra.mxu1 %v805_v42 }
 0x488   :  { %v3353_v43 = vpop.eup %3352 }
 0x489   :  { %v574_v44 = vmul.f32 %v3353_v43, %v3345_v24  ;;  %v2860_v43 = vld [vmem:[%s4091_s9] ss:$0 sm:$0xff] }
 0x48b   :  { %3072 = vmatmul.mubr.msk.f32.vlgmr.msra.gmra.mrb[4].mxu0 %vm531_vm3, %v574_v44 }
 0x48c   :  { %v3355_v45 = vpop.eup %3354  ;;  %3234 = vmatpush3.bf16.msra.mxu0 %v3231_v49 }
 0x48d   :  { %v575_v46 = vmul.f32 %v3355_v45, %v3347_v26  ;;  %3236 = vmatprep.subr.bf16.mxu0 %v3235_v55 }
 0x48f   :  { %3077 = vmatmul.mubr.msk.f32.vlgmr.msra.gmra.mrb[10].mxu1 %vm531_vm3, %v575_v46 }
 0x490   :  { %3238 = vmatpush3.bf16.msra.mxu0 %v3235_v55  ;;  %v1144_v55 = vld [vmem:[%s4094_s12 + $0x10] sm:$0xff] }
 0x4f2   :  { %v724_v50 = vpop.f32.mrb[8].mxu1 }
 0x4f3   :  { %v3068_v51 = vpop.f32.mrb[9].mxu1 }
 0x4f4   :  { %v1142_v51 = vld [vmem:[%s4094_s12] sm:$0xff] }
 0x4f5   :  { %v3247_v54 = vpack.c.bf16 %v1143_v53, %v1142_v51 }
 0x4f7   :  { %3248 = vmatprep.subr.bf16.mxu0 %v3247_v54 }
 0x556   :  { %v648_v57 = vpop.f32.mrb[2].mxu0 }
 0x557   :  { %v3063_v58 = vpop.f32.mrb[3].mxu0 }
 0x55e   :  { %v800_v59 = vpop.f32.mrb[4].mxu0 }
 0x55f   :  { %882 = vrot.lane.b32.xlu0 %v800_v59, %s3433_s4  ;;  %v3073_v60 = vpop.f32.mrb[5].mxu0  ;;  %v1146_v59 = vld [vmem:[%s4094_s12 + $0x20] sm:$0xff] }
 0x560   :  { %v1147_v60 = vld [vmem:[%s4094_s12 + $0x28] sm:$0xff] }
 0x562   :  { %v876_v61 = vpop.f32.mrb[10].mxu1 }
 0x563   :  { %884 = vrot.lane.b32.xlu1 %v876_v61, %s3433_s4  ;;  %v3078_v63 = vpop.f32.mrb[11].mxu1  ;;  %v3255_v61 = vpack.c.bf16 %v1147_v60, %v1146_v59 }
 0x564   :  { %v1148_v63 = vld [vmem:[%s4094_s12 + $0x30] sm:$0xff] }
 0x5d1   :  { %v883_v0 = vpop.permute.xlu0 %882 }
 0x5d2   :  { %v888_v1 = vsel %vm228_vm2, %v648_v57, %v883_v0  ;;  %v1145_v57 = vld [vmem:[%s4094_s12 + $0x18] sm:$0xff] }
 0x5d3   :  { %3087 = vmatprep.mubr.msk.f32.mxu0 %vm80_vm0, %v888_v1  ;;  %v3251_v58 = vpack.c.bf16 %v1145_v57, %v1144_v55  ;;  %v1149_v0 = vld [vmem:[%s4094_s12 + $0x38] sm:$0xff] }
 0x5d4   :  { %v3259_v1 = vpack.c.bf16 %v1149_v0, %v1148_v63 }
 0x5d5   :  { %v885_v3 = vpop.permute.xlu1 %884 }
 0x5d6   :  { %v889_v4 = vsel %vm228_vm2, %v724_v50, %v885_v3  ;;  %v2861_v3 = vld [vmem:[%s4093_s11] ss:$0 sm:$0xff] }
 0x5d7   :  { %3088 = vmatmul.mubr.msk.f32.vlgmr.msra.gmra.mrb[6].mxu0 %vm80_vm0, %v889_v4 }
 0x5d8   :  { %3250 = vmatpush3.bf16.msra.mxu0 %v3247_v54 }
 0x5d9   :  { %3252 = vmatprep.subr.bf16.mxu0 %v3251_v58 }
 0x5dc   :  { %3254 = vmatpush3.bf16.msra.mxu0 %v3251_v58 }
 0x5dd   :  { %3256 = vmatprep.subr.bf16.mxu0 %v3255_v61 }
 0x5e0   :  { %3258 = vmatpush3.bf16.msra.mxu0 %v3255_v61 }
 0x5e1   :  { %3260 = vmatprep.subr.bf16.mxu0 %v3259_v1 }
 0x5e4   :  { %3262 = vmatpush3.bf16.msra.mxu0 %v3259_v1 }
 0x5e5   :  { %3141 = vmatprep.subr.mxu0 %v3428_v40 }
 0x6aa   :  { %v3089_v6 = vpop.f32.mrb[6].mxu0 }
 0x6ab   :  { %v979_v7 = vadd.f32 %v3089_v6, %v2856_v5  ;;  %v973_v8 = vpop.f32.mrb[7].mxu0 }
 0x6ac   :  { %v974_v9 = vadd.f32 %v2856_v5, %v973_v8 }
 0x6ad   :  { %v983_v10 = vadd.f32 %v979_v7, %v3584_v39  ;;  %v1032_v39 = vld [vmem:[%s4092_s10] sm:$0xff] }
 0x6ae   :  { %v982_v11 = vadd.f32 %v974_v9, %v3580_v37  ;;  %v1033_v37 = vld [vmem:[%s4092_s10 + $0x8] sm:$0xff] }
 0x6af   :  { %v989_v12 = vsel %vm80_vm0, %v983_v10, 0.0  ;;  %v995_v16 = vmul.f32 %v983_v10, %v983_v10  ;;  %v3239_v19 = vpack.c.bf16 %v1033_v37, %v1032_v39 }
 0x6b0   :  { %990 = vadd.xlane.f32.xlu1 %v989_v12  ;;  %v986_v13 = vsel %vm80_vm0, %v982_v11, 0.0  ;;  %v994_v14 = vmul.f32 %v982_v11, %v982_v11 }
 0x6b1   :  { %987 = vadd.xlane.f32.xlu0 %v986_v13  ;;  %v999_v17 = vsel %vm80_vm0, %v995_v16, 0.0  ;;  %3240 = vmatprep.subr.bf16.mxu1 %v3239_v19 }
 0x6b2   :  { %v996_v15 = vsel %vm80_vm0, %v994_v14, 0.0  ;;  %3242 = vmatpush3.bf16.msra.mxu1 %v3239_v19 }
 0x6b3   :  { %3244 = vmatprep.subr.bf16.mxu1 %v3243_v21 }
 0x6b5   :  { %997 = vadd.xlane.f32.xlu0 %v996_v15 }
 0x6b6   :  { %3246 = vmatpush3.bf16.msra.mxu1 %v3243_v21 }
 0x6b9   :  { %1000 = vadd.xlane.f32.xlu0 %v999_v17 }
 0x73d   :  { %v991_v24 = vpop.xlane.xlu1 %990 }
 0x73e   :  { %v988_v22 = vpop.xlane.xlu0 %987  ;;  %v993_v26 = vmul.f32 0.03125, %v991_v24  ;;  %v2864_v24 = vld [vmem:[%s4095_s13] ss:$0 sm:$0xff] }
 0x73f   :  { %v992_v23 = vmul.f32 0.03125, %v988_v22 }
 0x740   :  { %v1005_v31 = vmul.f32 %v993_v26, %v993_v26  ;;  %v1009_v44 = vsub.f32 %v983_v10, %v993_v26 }
 0x741   :  { %v1004_v27 = vmul.f32 %v992_v23, %v992_v23  ;;  %v1008_v36 = vsub.f32 %v982_v11, %v992_v23 }
 0x742   :  { %v998_v25 = vpop.xlane.xlu0 %997 }
 0x743   :  { %v1002_v28 = vmul.f32 0.03125, %v998_v25 }
 0x745   :  { %v1006_v29 = vsub.f32 %v1002_v28, %v1004_v27 }
 0x746   :  { %v1001_v30 = vpop.xlane.xlu0 %1000 }
 0x747   :  { %v1010_v32 = vadd.f32 1e-12, %v1006_v29  ;;  %v1003_v33 = vmul.f32 0.03125, %v1001_v30 }
 0x749   :  { %3356 = vrsqrt.f32 %v1010_v32  ;;  %v1007_v34 = vsub.f32 %v1003_v33, %v1005_v31 }
 0x74b   :  { %v1011_v35 = vadd.f32 1e-12, %v1007_v34 }
 0x74d   :  { %3358 = vrsqrt.f32 %v1011_v35 }
 0x753   :  { %v3357_v38 = vpop.eup %3356 }
 0x754   :  { %v1014_v42 = vmul.f32 %v3357_v38, %v1008_v36  ;;  %v2869_v38 = vld [vmem:[%s4118_s1 + $0x20] sm:$0xff] }
 0x756   :  { %v1022_v45 = vmul.f32 %v2859_v41, %v1014_v42  ;;  %v2871_v42 = vld [vmem:[%s4118_s1 + $0x30] sm:$0xff] }
 0x757   :  { %v3359_v46 = vpop.eup %3358 }
 0x758   :  { %v1015_v47 = vmul.f32 %v3359_v46, %v1009_v44  ;;  %v1030_v48 = vadd.f32 %v2860_v43, %v1022_v45  ;;  %v2872_v44 = vld [vmem:[%s4118_s1 + $0x38] sm:$0xff] }
 0x759   :  { %v3267_v45 = vpack.c.bf16 %v2872_v44, %v2871_v42 }
 0x75a   :  { %v1023_v49 = vmul.f32 %v2859_v41, %v1015_v47  ;;  %3098 = vmatprep.mubr.msk.f32.mxu1 %vm80_vm0, %v1030_v48  ;;  %v2870_v41 = vld [vmem:[%s4118_s1 + $0x28] sm:$0xff] }
 0x75c   :  { %v1031_v50 = vadd.f32 %v2860_v43, %v1023_v49  ;;  %v3263_v43 = vpack.c.bf16 %v2870_v41, %v2869_v38 }
 0x75e   :  { %3099 = vmatmul.mubr.msk.f32.vlgmr.msra.gmra.mrb[12].mxu1 %vm80_vm0, %v1031_v50  ;;  %3264 = vmatprep.subr.bf16.mxu1 %v3263_v43 }
 0x75f   :  { %3266 = vmatpush3.bf16.msra.mxu1 %v3263_v43 }
 0x760   :  { %3268 = vmatprep.subr.bf16.mxu1 %v3267_v45 }
 0x763   :  { %3270 = vmatpush3.bf16.msra.mxu1 %v3267_v45 }
 0x764   :  { %3131 = vmatprep.subr.mxu1 %v3428_v40 }
 0x831   :  { %v3100_v4 = vpop.f32.mrb[12].mxu1 }
 0x832   :  { %v1121_v5 = vadd.f32 %v3100_v4, %v2861_v3  ;;  %v1115_v6 = vpop.f32.mrb[13].mxu1 }
 0x833   :  { %v1116_v7 = vadd.f32 %v2861_v3, %v1115_v6  ;;  %v2867_v3 = vld [vmem:[%s4096_s14] ss:$0 sm:$0xff] }
 0x834   :  { %v1125_v8 = vmul.f32 %v1121_v5, %v1121_v5 }
 0x835   :  { %v1124_v9 = vmul.f32 %v1116_v7, %v1116_v7 }
 0x836   :  { %v1127_v10 = vmul.f32 %v1125_v8, %v1121_v5 }
 0x837   :  { %v1126_v11 = vmul.f32 %v1124_v9, %v1116_v7 }
 0x838   :  { %v1129_v12 = vmul.f32 0.044715, %v1127_v10 }
 0x839   :  { %v1128_v13 = vmul.f32 0.044715, %v1126_v11 }
 0x83a   :  { %v1131_v14 = vadd.f32 %v1129_v12, %v1121_v5  ;;  %v2874_v12 = vld [vmem:[%s4121_s5 + $0x1] ss:$0 sm:$0xff] }
 0x83b   :  { %v1130_v15 = vadd.f32 %v1128_v13, %v1116_v7 }
 0x83c   :  { %v1133_v16 = vmul.f32 0.7978846, %v1131_v14 }
 0x83d   :  { %v1132_v17 = vmul.f32 0.7978846, %v1130_v15 }
 0x83e   :  { %3360 = vtanh.f32 %v1133_v16 }
 0x83f   :  { %3362 = vtanh.f32 %v1132_v17 }
 0x848   :  { %v3361_v39 = vpop.eup %3360 }
 0x849   :  { %v3363_v37 = vpop.eup %3362  ;;  %v1137_v18 = vadd.f32 1.0, %v3361_v39 }
 0x84a   :  { %v1136_v19 = vadd.f32 1.0, %v3363_v37 }
 0x84b   :  { %v1139_v20 = vmul.f32 0.5, %v1137_v18 }
 0x84c   :  { %v1138_v21 = vmul.f32 0.5, %v1136_v19 }
 0x84d   :  { %v1141_v23 = vmul.f32 %v1139_v20, %v1121_v5 }
 0x84e   :  { %v1140_v22 = vmul.f32 %v1138_v21, %v1116_v7  ;;  %v2868_v7 = vld [vmem:[%s4097_s15] ss:$0 sm:$0xff] }
 0x850   :  { %3117 = vmatprep.mubr.msk.f32.mxu0 %vm1157_vm4, %v1140_v22 }
 0x851   :  { %3118 = vmatmul.mubr.msk.f32.vlgmr.msra.gmra.mrb[8].mxu0 %vm1157_vm4, %v1141_v23 }
 0x852   :  { %3143 = vmatprep.mubr.msk.f32.mxu0 %vm3429_vm1, %v3428_v40 }
 0x924   :  { %v3119_v25 = vpop.f32.mrb[8].mxu0 }
 0x925   :  { %v1236_v26 = vadd.f32 %v3119_v25, %v2864_v24  ;;  %v1230_v27 = vpop.f32.mrb[9].mxu0 }
 0x926   :  { %v1231_v28 = vadd.f32 %v2864_v24, %v1230_v27 }
 0x927   :  { %v1240_v29 = vadd.f32 %v1236_v26, %v1031_v50 }
 0x928   :  { %v1239_v30 = vadd.f32 %v1231_v28, %v1030_v48 }
 0x929   :  { %v1246_v31 = vsel %vm80_vm0, %v1240_v29, 0.0  ;;  %v1252_v32 = vmul.f32 %v1240_v29, %v1240_v29 }
 0x92a   :  { %1247 = vadd.xlane.f32.xlu1 %v1246_v31  ;;  %v1243_v33 = vsel %vm80_vm0, %v1239_v30, 0.0  ;;  %v1251_v34 = vmul.f32 %v1239_v30, %v1239_v30 }
 0x92b   :  { %1244 = vadd.xlane.f32.xlu0 %v1243_v33  ;;  %v1256_v35 = vsel %vm80_vm0, %v1252_v32, 0.0 }
 0x92c   :  { %v1253_v36 = vsel %vm80_vm0, %v1251_v34, 0.0 }
 0x92e   :  { %1257 = vadd.xlane.f32.xlu1 %v1256_v35 }
 0x92f   :  { %1254 = vadd.xlane.f32.xlu0 %v1253_v36 }
 0x9b7   :  { %v1248_v46 = vpop.xlane.xlu1 %1247 }
 0x9b8   :  { %v1250_v47 = vmul.f32 0.03125, %v1248_v46  ;;  %v1245_v48 = vpop.xlane.xlu0 %1244 }
 0x9b9   :  { %v1249_v49 = vmul.f32 0.03125, %v1245_v48 }
 0x9ba   :  { %v1262_v51 = vmul.f32 %v1250_v47, %v1250_v47  ;;  %v1266_v63 = vsub.f32 %v1240_v29, %v1250_v47 }
 0x9bb   :  { %v1258_v50 = vpop.xlane.xlu1 %1257  ;;  %v1261_v55 = vmul.f32 %v1249_v49, %v1249_v49  ;;  %v1265_v1 = vsub.f32 %v1239_v30, %v1249_v49 }
 0x9bc   :  { %v1260_v53 = vmul.f32 0.03125, %v1258_v50  ;;  %v1255_v54 = vpop.xlane.xlu0 %1254 }
 0x9bd   :  { %v1259_v57 = vmul.f32 0.03125, %v1255_v54 }
 0x9be   :  { %v1264_v58 = vsub.f32 %v1260_v53, %v1262_v51 }
 0x9bf   :  { %v1263_v59 = vsub.f32 %v1259_v57, %v1261_v55 }
 0x9c0   :  { %v1268_v60 = vadd.f32 1e-12, %v1264_v58 }
 0x9c1   :  { %v1267_v61 = vadd.f32 1e-12, %v1263_v59 }
 0x9c2   :  { %3364 = vrsqrt.f32 %v1268_v60 }
 0x9c3   :  { %3366 = vrsqrt.f32 %v1267_v61 }
 0x9cc   :  { %v3365_v0 = vpop.eup %3364 }
 0x9cd   :  { %v3367_v4 = vpop.eup %3366  ;;  %v1272_v5 = vmul.f32 %v3365_v0, %v1266_v63 }
 0x9ce   :  { %v1271_v6 = vmul.f32 %v3367_v4, %v1265_v1 }
 0x9cf   :  { %v1280_v8 = vmul.f32 %v2867_v3, %v1272_v5 }
 0x9d0   :  { %v1279_v9 = vmul.f32 %v2867_v3, %v1271_v6 }
 0x9d1   :  { %v3798_v11 = vadd.f32 %v2868_v7, %v1280_v8 }
 0x9d2   :  { %v3796_v10 = vadd.f32 %v2868_v7, %v1279_v9 }
 0x9d4   :  { %3128 = vmatprep.mubr.msk.f32.mxu1 %vm80_vm0, %v3796_v10 }
 0x9d5   :  { %3129 = vmatmul.mubr.msk.f32.vlgmr.msra.gmra.mrb[14].mxu1 %vm80_vm0, %v3798_v11 }
 0x9d6   :  { %3133 = vmatprep.mubr.msk.f32.mxu1 %vm3429_vm1, %v3428_v40 }
 0xaa8   :  { %v3130_v13 = vpop.f32.mrb[14].mxu1 }
 0xaa9   :  { %v3809_v14 = vadd.f32 %v3130_v13, %v2874_v12  ;;  %v1374_v15 = vpop.f32.mrb[15].mxu1 }
 0xaaa   :  { %v3811_v16 = vadd.f32 %v2874_v12, %v1374_v15  ;;  %v2890_v15 = vld [vmem:[%s4123_s26 + $0x28] sm:$0xff] }
 0xaab   :  { %1387 = vrot.lane.b32.xlu1 %v3809_v14, %s3430_s24 }
 0xaac   :  { %1385 = vrot.lane.b32.xlu0 %v3811_v16, %s3430_s24 }
 0xaaf   :  { %1389 = vrot.lane.b32.xlu1 %v3811_v16, %s3431_s6 }
 0xab3   :  { %1465 = vrot.lane.b32.xlu1 %v3809_v14, %s3431_s6 }
 0xb1d   :  { %v3821_v17 = vpop.permute.xlu1 %1387 }
 0xb1e   :  { %1617 = vrot.lane.b32.xlu1 %v3821_v17, %s3431_s6  ;;  %v3825_v39 = vpop.permute.xlu0 %1385 }
 0xb1f   :  { %1541 = vrot.lane.b32.xlu0 %v3825_v39, %s3431_s6 }
 0xb21   :  { %v1390_v37 = vpop.permute.xlu1 %1389 }
 0xb22   :  { %3132 = vmatpush3.xpose.msk.msra.mxu1 %vm228_vm2, %v1390_v37 }
 0xb23   :  { %3136 = vmatprep.subr.mxu1 %v3428_v40 }
 0xb25   :  { %3134 = vmatmul.mubr.msk.f32.vlgmr.msra.gmra.mrb[16].mxu1 %vm228_vm2, %v3811_v16  ;;  %v1466_v18 = vpop.permute.xlu1 %1465 }
 0xb26   :  { %3137 = vmatpush3.xpose.msk.msra.mxu1 %vm228_vm2, %v1466_v18  ;;  %3138 = vmatprep.mubr.msk.f32.mxu1 %vm3429_vm1, %v3428_v40 }
 0xb27   :  { %3146 = vmatprep.subr.mxu1 %v3428_v40 }
 0xb29   :  { %3139 = vmatmul.mubr.msk.f32.vlgmr.msra.gmra.mrb[18].mxu1 %vm228_vm2, %v3809_v14 }
 0xb2a   :  { %3148 = vmatprep.mubr.msk.f32.mxu1 %vm3429_vm1, %v3428_v40 }
 0xb90   :  { %v1618_v19 = vpop.permute.xlu1 %1617 }
 0xb91   :  { %3147 = vmatpush3.xpose.msk.msra.mxu1 %vm228_vm2, %v1618_v19  ;;  %v1542_v20 = vpop.permute.xlu0 %1541 }
 0xb92   :  { %3142 = vmatpush3.xpose.msk.msra.mxu0 %vm228_vm2, %v1542_v20  ;;  %3156 = vmatprep.subr.mxu1 %v3428_v40 }
 0xb93   :  { %3151 = vmatprep.subr.mxu0 %v3428_v40 }
 0xb94   :  { %3149 = vmatmul.mubr.msk.f32.vlgmr.msra.gmra.mrb[20].mxu1 %vm228_vm2, %v3821_v17 }
 0xb95   :  { %3144 = vmatmul.mubr.msk.f32.vlgmr.msra.gmra.mrb[10].mxu0 %vm228_vm2, %v3825_v39  ;;  %3158 = vmatprep.mubr.msk.f32.mxu1 %vm3429_vm1, %v3428_v40 }
 0xb96   :  { %3153 = vmatprep.mubr.msk.f32.mxu0 %vm3429_vm1, %v3428_v40 }
 0xbf8   :  { %v1461_v21 = vpop.f32.mrb[16].mxu1 }
 0xbf9   :  { %v1462_v22 = vadd.f32 %v1461_v21, %v3644_v52  ;;  %v3135_v23 = vpop.f32.mrb[17].mxu1 }
 0xbfb   :  { %v1693_v24 = vsel %vm531_vm3, %v1462_v22, -inf }
 0xbfc   :  { %v1537_v25 = vpop.f32.mrb[18].mxu1  ;;  %1694 = vmax.xlane.f32.xlu0 %v1693_v24 }
 0xbfd   :  { %v1538_v26 = vadd.f32 %v1537_v25, %v3650_v56  ;;  %v3140_v27 = vpop.f32.mrb[19].mxu1 }
 0xbff   :  { %v1696_v28 = vsel %vm531_vm3, %v1538_v26, -inf }
 0xc00   :  { %1697 = vmax.xlane.f32.xlu1 %v1696_v28 }
 0xc67   :  { %v1689_v29 = vpop.f32.mrb[20].mxu1 }
 0xc68   :  { %v1613_v30 = vpop.f32.mrb[10].mxu0  ;;  %v3150_v31 = vpop.f32.mrb[21].mxu1  ;;  %v1690_v34 = vadd.f32 %v1689_v29, %v3664_v2 }
 0xc69   :  { %v1614_v32 = vadd.f32 %v1613_v30, %v3658_v62  ;;  %v3145_v33 = vpop.f32.mrb[11].mxu0  ;;  %v2894_v30 = vld [vmem:[%s4089_s7 + $0x1] ss:$0 sm:$0xff] }
 0xc6a   :  { %v1702_v35 = vsel %vm531_vm3, %v1690_v34, -inf }
 0xc6b   :  { %v1699_v52 = vsel %vm531_vm3, %v1614_v32, -inf }
 0xc6c   :  { %1700 = vmax.xlane.f32.xlu0 %v1699_v52 }
 0xc70   :  { %1703 = vmax.xlane.f32.xlu0 %v1702_v35 }
 0xc89   :  { %v1695_v36 = vpop.xlane.xlu0 %1694 }
 0xc8a   :  { %v1705_v56 = vsub.f32 %v1462_v22, %v1695_v36 }
 0xc8c   :  { %v1709_v38 = vmul.f32 1.442695, %v1705_v56 }
 0xc8d   :  { %v1698_v41 = vpop.xlane.xlu1 %1697 }
 0xc8e   :  { %3368 = vpow2.f32 %v1709_v38  ;;  %v1706_v42 = vsub.f32 %v1538_v26, %v1698_v41 }
 0xc90   :  { %v1711_v43 = vmul.f32 1.442695, %v1706_v42 }
 0xc92   :  { %3370 = vpow2.f32 %v1711_v43 }
 0xc98   :  { %v3369_v44 = vpop.eup %3368 }
 0xc99   :  { %v1717_v62 = vsel %vm531_vm3, %v3369_v44, 0.0 }
 0xc9a   :  { %1718 = vadd.xlane.f32.xlu0 %v1717_v62 }
 0xc9c   :  { %v3371_v45 = vpop.eup %3370 }
 0xc9d   :  { %v1720_v2 = vsel %vm531_vm3, %v3371_v45, 0.0 }
 0xc9e   :  { %1721 = vadd.xlane.f32.xlu1 %v1720_v2 }
 0xcf9   :  { %v1701_v46 = vpop.xlane.xlu0 %1700 }
 0xcfa   :  { %v1707_v47 = vsub.f32 %v1614_v32, %v1701_v46 }
 0xcfc   :  { %v1713_v48 = vmul.f32 1.442695, %v1707_v47 }
 0xcfd   :  { %v1704_v49 = vpop.xlane.xlu0 %1703 }
 0xcfe   :  { %3372 = vpow2.f32 %v1713_v48  ;;  %v1708_v50 = vsub.f32 %v1690_v34, %v1704_v49 }
 0xd00   :  { %v1715_v51 = vmul.f32 1.442695, %v1708_v50 }
 0xd02   :  { %3374 = vpow2.f32 %v1715_v51 }
 0xd08   :  { %v3373_v53 = vpop.eup %3372 }
 0xd09   :  { %v1723_v54 = vsel %vm531_vm3, %v3373_v53, 0.0 }
 0xd0a   :  { %1724 = vadd.xlane.f32.xlu0 %v1723_v54 }
 0xd0c   :  { %v3375_v55 = vpop.eup %3374 }
 0xd0d   :  { %v1726_v57 = vsel %vm531_vm3, %v3375_v55, 0.0 }
 0xd0e   :  { %1727 = vadd.xlane.f32.xlu1 %v1726_v57 }
 0xd1f   :  { %1813 = vrot.lane.b32.xlu1 %v3809_v14, %s3432_s0  ;;  %v2889_v14 = vld [vmem:[%s4123_s26 + $0x20] sm:$0xff] }
 0xd20   :  { %1737 = vrot.lane.b32.xlu0 %v3811_v16, %s3432_s0  ;;  %v3271_v16 = vpack.c.bf16 %v2890_v15, %v2889_v14  ;;  %v2909_v14 = vld [vmem:[%s4094_s12 + $0x40] sm:$0xff]  ;;  %v2910_v15 = vld [vmem:[%s4094_s12 + $0x48] sm:$0xff] }
 0xd23   :  { %1889 = vrot.lane.b32.xlu1 %v3825_v39, %s3432_s0  ;;  %v2892_v39 = vld [vmem:[%s4123_s26 + $0x38] sm:$0xff] }
 0xd27   :  { %1965 = vrot.lane.b32.xlu1 %v3821_v17, %s3432_s0  ;;  %v1719_v58 = vpop.xlane.xlu0 %1718  ;;  %v2891_v17 = vld [vmem:[%s4123_s26 + $0x30] sm:$0xff]  ;;  %s3434_s0 = smov [#allocation2]  }
 0xd28   :  { %3376 = vrcp.f32 %v1719_v58  ;;  %v3275_v37 = vpack.c.bf16 %v2892_v39, %v2891_v17  ;;  %v2911_v17 = vld [vmem:[%s4094_s12 + $0x50] sm:$0xff]  ;;  %v2912_v39 = vld [vmem:[%s4094_s12 + $0x58] sm:$0xff] }
 0xd2b   :  { %v1722_v59 = vpop.xlane.xlu1 %1721 }
 0xd2c   :  { %3378 = vrcp.f32 %v1722_v59 }
 0xd32   :  { %v3377_v61 = vpop.eup %3376 }
 0xd33   :  { %v1733_v63 = vmul.f32 %v3377_v61, %v3369_v44  ;;  %v2903_v44 = vld [vmem:[%s4092_s10 + $0x30] sm:$0xff] }
 0xd36   :  { %v3379_v3 = vpop.eup %3378 }
 0xd37   :  { %v1734_v4 = vmul.f32 %v3379_v3, %v3371_v45  ;;  %v2904_v45 = vld [vmem:[%s4092_s10 + $0x38] sm:$0xff] }
 0xd38   :  { %v3283_v2 = vpack.c.bf16 %v2904_v45, %v2903_v44  ;;  %v2918_v45 = vld [vmem:[%s4095_s13 + $0x1] ss:$0 sm:$0xff] }
 0xd97   :  { %v1725_v60 = vpop.xlane.xlu0 %1724 }
 0xd98   :  { %3380 = vrcp.f32 %v1725_v60 }
 0xd9b   :  { %v1728_v0 = vpop.xlane.xlu1 %1727  ;;  %v1738_v1 = vpop.permute.xlu0 %1737 }
 0xd9c   :  { %3382 = vrcp.f32 %v1728_v0  ;;  %3152 = vmatpush3.msra.mxu0 %v1738_v1  ;;  %v2899_v1 = vld [vmem:[%s4090_s8 + $0x1] ss:$0 sm:$0xff] }
 0xd9d   :  { %3154 = vmatmul.mubr.msk.f32.vlgmr.msra.gmra.mrb[12].mxu0 %vm531_vm3, %v1733_v63  ;;  %3161 = vmatprep.subr.mxu0 %v3428_v40 }
 0xd9e   :  { %3163 = vmatprep.mubr.msk.f32.mxu0 %vm3429_vm1, %v3428_v40 }
 0xd9f   :  { %v1814_v5 = vpop.permute.xlu1 %1813 }
 0xda0   :  { %3157 = vmatpush3.msra.mxu1 %v1814_v5 }
 0xda1   :  { %3159 = vmatmul.mubr.msk.f32.vlgmr.msra.gmra.mrb[22].mxu1 %vm531_vm3, %v1734_v4  ;;  %3166 = vmatprep.subr.mxu1 %v3428_v40  ;;  %v2900_v4 = vld [vmem:[%s4091_s9 + $0x1] ss:$0 sm:$0xff] }
 0xda2   :  { %v3381_v6 = vpop.eup %3380  ;;  %3168 = vmatprep.mubr.msk.f32.mxu1 %vm3429_vm1, %v3428_v40 }
 0xda3   :  { %v1735_v7 = vmul.f32 %v3381_v6, %v3373_v53  ;;  %v1890_v8 = vpop.permute.xlu1 %1889 }
 0xda4   :  { %3162 = vmatpush3.msra.mxu0 %v1890_v8 }
 0xda5   :  { %3164 = vmatmul.mubr.msk.f32.vlgmr.msra.gmra.mrb[14].mxu0 %vm531_vm3, %v1735_v7  ;;  %3272 = vmatprep.subr.bf16.mxu0 %v3271_v16 }
 0xda6   :  { %v3383_v9 = vpop.eup %3382  ;;  %3274 = vmatpush3.bf16.msra.mxu0 %v3271_v16  ;;  %v3287_v16 = vpack.c.bf16 %v2910_v15, %v2909_v14 }
 0xda7   :  { %v1736_v12 = vmul.f32 %v3383_v9, %v3375_v55  ;;  %v1966_v13 = vpop.permute.xlu1 %1965  ;;  %3276 = vmatprep.subr.bf16.mxu0 %v3275_v37 }
 0xda8   :  { %3167 = vmatpush3.msra.mxu1 %v1966_v13 }
 0xda9   :  { %3169 = vmatmul.mubr.msk.f32.vlgmr.msra.gmra.mrb[24].mxu1 %vm531_vm3, %v1736_v12 }
 0xdaa   :  { %3278 = vmatpush3.bf16.msra.mxu0 %v3275_v37  ;;  %v3291_v37 = vpack.c.bf16 %v2912_v39, %v2911_v17 }
 0xdab   :  { %3288 = vmatprep.subr.bf16.mxu0 %v3287_v16 }
 0xe70   :  { %v1809_v18 = vpop.f32.mrb[12].mxu0 }
 0xe71   :  { %v3155_v19 = vpop.f32.mrb[13].mxu0 }
 0xe72   :  { %v2914_v19 = vld [vmem:[%s4094_s12 + $0x68] sm:$0xff] }
 0xe74   :  { %v1885_v20 = vpop.f32.mrb[22].mxu1 }
 0xe75   :  { %v3160_v21 = vpop.f32.mrb[23].mxu1 }
 0xe76   :  { %v2915_v21 = vld [vmem:[%s4094_s12 + $0x70] sm:$0xff] }
 0xe78   :  { %v1961_v22 = vpop.f32.mrb[14].mxu0 }
 0xe79   :  { %2043 = vrot.lane.b32.xlu0 %v1961_v22, %s3433_s4  ;;  %v3165_v23 = vpop.f32.mrb[15].mxu0  ;;  %v2916_v22 = vld [vmem:[%s4094_s12 + $0x78] sm:$0xff] }
 0xe7a   :  { %v3299_v23 = vpack.c.bf16 %v2916_v22, %v2915_v21 }
 0xe7c   :  { %v2037_v24 = vpop.f32.mrb[24].mxu1 }
 0xe7d   :  { %2045 = vrot.lane.b32.xlu1 %v2037_v24, %s3433_s4  ;;  %v3170_v25 = vpop.f32.mrb[25].mxu1  ;;  %v2906_v24 = vld [vmem:[%s4093_s11 + $0x1] ss:$0 sm:$0xff]  ;;  %s2828_s11 = sshll.u32 %s3434_s0, 4  ;;  %s2829_s11 = int_to_ptr.vmem [resolvable:$true] %s2828_s11 }
 0xe7e   :  { %p3409_p1 = scmp.lt.s32.totalorder %s2829_s11, %s2829_s11 }
 0xeeb   :  { %v2044_v26 = vpop.permute.xlu0 %2043 }
 0xeec   :  { %v2049_v27 = vsel %vm228_vm2, %v1809_v18, %v2044_v26  ;;  %v2913_v18 = vld [vmem:[%s4094_s12 + $0x60] sm:$0xff] }
 0xeed   :  { %3179 = vmatprep.mubr.msk.f32.mxu0 %vm80_vm0, %v2049_v27 }
 0xeef   :  { %v2046_v28 = vpop.permute.xlu1 %2045 }
 0xef0   :  { %v2050_v29 = vsel %vm228_vm2, %v1885_v20, %v2046_v28  ;;  %v3295_v20 = vpack.c.bf16 %v2914_v19, %v2913_v18 }
 0xef1   :  { %3180 = vmatmul.mubr.msk.f32.vlgmr.msra.gmra.mrb[16].mxu0 %vm80_vm0, %v2050_v29 }
 0xef2   :  { %3290 = vmatpush3.bf16.msra.mxu0 %v3287_v16 }
 0xef3   :  { %3292 = vmatprep.subr.bf16.mxu0 %v3291_v37 }
 0xef6   :  { %3294 = vmatpush3.bf16.msra.mxu0 %v3291_v37 }
 0xef7   :  { %3296 = vmatprep.subr.bf16.mxu0 %v3295_v20 }
 0xefa   :  { %3298 = vmatpush3.bf16.msra.mxu0 %v3295_v20  ;;  %v2923_v20 = vld [vmem:[%s4096_s14 + $0x1] ss:$0 sm:$0xff] }
 0xefb   :  { %3300 = vmatprep.subr.bf16.mxu0 %v3299_v23 }
 0xefe   :  { %3302 = vmatpush3.bf16.msra.mxu0 %v3299_v23 }
 0xfc4   :  { %v3181_v31 = vpop.f32.mrb[16].mxu0 }
 0xfc5   :  { %v2142_v32 = vadd.f32 %v3181_v31, %v2894_v30  ;;  %v2136_v33 = vpop.f32.mrb[17].mxu0 }
 0xfc6   :  { %v2137_v34 = vadd.f32 %v2894_v30, %v2136_v33 }
 0xfc7   :  { %v2146_v52 = vadd.f32 %v2142_v32, %v3798_v11  ;;  %v2901_v11 = vld [vmem:[%s4092_s10 + $0x20] sm:$0xff] }
 0xfc8   :  { %v2145_v35 = vadd.f32 %v2137_v34, %v3796_v10  ;;  %v2902_v10 = vld [vmem:[%s4092_s10 + $0x28] sm:$0xff] }
 0xfc9   :  { %v2154_v36 = vsel %vm80_vm0, %v2146_v52, 0.0  ;;  %v2160_v42 = vmul.f32 %v2146_v52, %v2146_v52  ;;  %v3279_v62 = vpack.c.bf16 %v2902_v10, %v2901_v11 }
 0xfca   :  { %2155 = vadd.xlane.f32.xlu1 %v2154_v36  ;;  %v2151_v56 = vsel %vm80_vm0, %v2145_v35, 0.0  ;;  %v2159_v38 = vmul.f32 %v2145_v35, %v2145_v35 }
 0xfcb   :  { %2152 = vadd.xlane.f32.xlu0 %v2151_v56  ;;  %v2164_v43 = vsel %vm80_vm0, %v2160_v42, 0.0  ;;  %3280 = vmatprep.subr.bf16.mxu1 %v3279_v62 }
 0xfcc   :  { %v2161_v41 = vsel %vm80_vm0, %v2159_v38, 0.0  ;;  %3282 = vmatpush3.bf16.msra.mxu1 %v3279_v62 }
 0xfcd   :  { %3284 = vmatprep.subr.bf16.mxu1 %v3283_v2 }
 0xfcf   :  { %2162 = vadd.xlane.f32.xlu0 %v2161_v41 }
 0xfd0   :  { %3286 = vmatpush3.bf16.msra.mxu1 %v3283_v2 }
 0xfd3   :  { %2165 = vadd.xlane.f32.xlu0 %v2164_v43 }
0x1057   :  { %v2156_v48 = vpop.xlane.xlu1 %2155 }
0x1058   :  { %v2153_v46 = vpop.xlane.xlu0 %2152  ;;  %v2158_v50 = vmul.f32 0.03125, %v2156_v48 }
0x1059   :  { %v2157_v47 = vmul.f32 0.03125, %v2153_v46 }
0x105a   :  { %v2170_v57 = vmul.f32 %v2158_v50, %v2158_v50  ;;  %v2174_v5 = vsub.f32 %v2146_v52, %v2158_v50 }
0x105b   :  { %v2169_v51 = vmul.f32 %v2157_v47, %v2157_v47  ;;  %v2173_v63 = vsub.f32 %v2145_v35, %v2157_v47 }
0x105c   :  { %v2163_v49 = vpop.xlane.xlu0 %2162 }
0x105d   :  { %v2167_v53 = vmul.f32 0.03125, %v2163_v49 }
0x105f   :  { %v2171_v54 = vsub.f32 %v2167_v53, %v2169_v51 }
0x1060   :  { %v2166_v55 = vpop.xlane.xlu0 %2165 }
0x1061   :  { %v2175_v58 = vadd.f32 1e-12, %v2171_v54  ;;  %v2168_v59 = vmul.f32 0.03125, %v2166_v55 }
0x1063   :  { %3384 = vrsqrt.f32 %v2175_v58  ;;  %v2172_v60 = vsub.f32 %v2168_v59, %v2170_v57  ;;  %v2459_v59 = vld [vmem:[%s4098_s16] sm:$0xff] }
0x1065   :  { %v2176_v61 = vadd.f32 1e-12, %v2172_v60  ;;  %v2460_v60 = vld [vmem:[%s4098_s16 + $0x8] sm:$0xff] }
0x1067   :  { %3386 = vrsqrt.f32 %v2176_v61  ;;  %v2461_v61 = vld [vmem:[%s4098_s16 + $0x10] sm:$0xff] }
0x106d   :  { %v3385_v0 = vpop.eup %3384 }
0x106e   :  { %v2179_v3 = vmul.f32 %v3385_v0, %v2173_v63  ;;  %v3303_v63 = vpack.c.bf16 %v2460_v60, %v2459_v59  ;;  %v2462_v0 = vld [vmem:[%s4098_s16 + $0x18] sm:$0xff] }
0x106f   :  { %v2620_v59 = vld [vmem:[%s4102_s20 + $0x18] sm:$0xff] }
0x1070   :  { %v2187_v6 = vmul.f32 %v2899_v1, %v2179_v3  ;;  %3304 = vmatprep.subr.bf16.mxu1 %v3303_v63 }
0x1071   :  { %v3387_v7 = vpop.eup %3386 }
0x1072   :  { %v2180_v8 = vmul.f32 %v3387_v7, %v2174_v5  ;;  %v2195_v9 = vadd.f32 %v2900_v4, %v2187_v6 }
0x1074   :  { %v2188_v12 = vmul.f32 %v2899_v1, %v2180_v8  ;;  %3190 = vmatprep.mubr.msk.f32.mxu1 %vm80_vm0, %v2195_v9  ;;  %v3307_v1 = vpack.c.bf16 %v2462_v0, %v2461_v61  ;;  %v2624_v61 = vld [vmem:[%s4102_s20 + $0x38] sm:$0xff]  ;;  %v2621_v0 = vld [vmem:[%s4102_s20 + $0x20] sm:$0xff] }
0x1076   :  { %v2196_v13 = vadd.f32 %v2900_v4, %v2188_v12 }
0x1078   :  { %3191 = vmatmul.mubr.msk.f32.vlgmr.msra.gmra.mrb[26].mxu1 %vm80_vm0, %v2196_v13 }
0x1079   :  { %3306 = vmatpush3.bf16.msra.mxu1 %v3303_v63  ;;  %v2617_v63 = vld [vmem:[%s4102_s20] sm:$0xff] }
0x107a   :  { %3308 = vmatprep.subr.bf16.mxu1 %v3307_v1 }
0x107d   :  { %3310 = vmatpush3.bf16.msra.mxu1 %v3307_v1  ;;  %v3319_v1 = vpack.c.bf16 %v2624_v61, %v2620_v59 }
0x107f   :  { %3320 = vmatprep.subr.bf16.mxu0 %v3319_v1 }
0x114b   :  { %v3192_v25 = vpop.f32.mrb[26].mxu1 }
0x114c   :  { %v2288_v26 = vadd.f32 %v3192_v25, %v2906_v24  ;;  %v2282_v27 = vpop.f32.mrb[27].mxu1 }
0x114d   :  { %v2283_v28 = vadd.f32 %v2906_v24, %v2282_v27  ;;  %v2924_v24 = vld [vmem:[%s4097_s15 + $0x1] ss:$0 sm:$0xff] }
0x114e   :  { %v2292_v29 = vmul.f32 %v2288_v26, %v2288_v26 }
0x114f   :  { %v2291_v30 = vmul.f32 %v2283_v28, %v2283_v28 }
0x1150   :  { %v2294_v31 = vmul.f32 %v2292_v29, %v2288_v26  ;;  %v2925_v29 = vld [vmem:[%s4099_s17] ss:$0 sm:$0xff] }
0x1151   :  { %v2293_v32 = vmul.f32 %v2291_v30, %v2283_v28 }
0x1152   :  { %v2296_v33 = vmul.f32 0.044715, %v2294_v31 }
0x1153   :  { %v2295_v34 = vmul.f32 0.044715, %v2293_v32 }
0x1154   :  { %v2298_v52 = vadd.f32 %v2296_v33, %v2288_v26 }
0x1155   :  { %v2297_v35 = vadd.f32 %v2295_v34, %v2283_v28 }
0x1156   :  { %v2300_v36 = vmul.f32 0.7978846, %v2298_v52 }
0x1157   :  { %v2299_v56 = vmul.f32 0.7978846, %v2297_v35 }
0x1158   :  { %3388 = vtanh.f32 %v2300_v36 }
0x1159   :  { %3390 = vtanh.f32 %v2299_v56 }
0x1162   :  { %v3389_v38 = vpop.eup %3388 }
0x1163   :  { %v3391_v41 = vpop.eup %3390  ;;  %v2304_v42 = vadd.f32 1.0, %v3389_v38 }
0x1164   :  { %v2303_v43 = vadd.f32 1.0, %v3391_v41 }
0x1165   :  { %v2306_v11 = vmul.f32 0.5, %v2304_v42 }
0x1166   :  { %v2305_v10 = vmul.f32 0.5, %v2303_v43 }
0x1167   :  { %v2308_v62 = vmul.f32 %v2306_v11, %v2288_v26 }
0x1168   :  { %v2307_v44 = vmul.f32 %v2305_v10, %v2283_v28 }
0x116a   :  { %3209 = vmatprep.mubr.msk.f32.mxu0 %vm1157_vm4, %v2307_v44 }
0x116b   :  { %3210 = vmatmul.mubr.msk.f32.vlgmr.msra.gmra.mrb[18].mxu0 %vm1157_vm4, %v2308_v62 }
0x116c   :  { %2802 = vmatprep.mubr.f32.mxu0 %v3428_v40 }
0x123e   :  { %v3211_v2 = vpop.f32.mrb[18].mxu0 }
0x123f   :  { %v2404_v46 = vadd.f32 %v3211_v2, %v2918_v45  ;;  %v2398_v47 = vpop.f32.mrb[19].mxu0 }
0x1240   :  { %v2399_v48 = vadd.f32 %v2918_v45, %v2398_v47 }
0x1241   :  { %v2408_v49 = vadd.f32 %v2404_v46, %v2196_v13 }
0x1242   :  { %v2407_v50 = vadd.f32 %v2399_v48, %v2195_v9 }
0x1243   :  { %v2416_v51 = vsel %vm80_vm0, %v2408_v49, 0.0  ;;  %v2422_v53 = vmul.f32 %v2408_v49, %v2408_v49 }
0x1244   :  { %2417 = vadd.xlane.f32.xlu1 %v2416_v51  ;;  %v2413_v54 = vsel %vm80_vm0, %v2407_v50, 0.0  ;;  %v2421_v55 = vmul.f32 %v2407_v50, %v2407_v50 }
0x1245   :  { %2414 = vadd.xlane.f32.xlu0 %v2413_v54  ;;  %v2426_v57 = vsel %vm80_vm0, %v2422_v53, 0.0 }
0x1246   :  { %v2423_v58 = vsel %vm80_vm0, %v2421_v55, 0.0 }
0x1248   :  { %2427 = vadd.xlane.f32.xlu1 %v2426_v57  ;;  %v2618_v57 = vld [vmem:[%s4102_s20 + $0x8] sm:$0xff] }
0x1249   :  { %2424 = vadd.xlane.f32.xlu0 %v2423_v58  ;;  %v2622_v58 = vld [vmem:[%s4102_s20 + $0x28] sm:$0xff] }
0x124a   :  { %v3311_v60 = vpack.c.bf16 %v2622_v58, %v2618_v57 }
0x124c   :  { %3312 = vmatprep.subr.bf16.mxu1 %v3311_v60 }
0x12d1   :  { %v2418_v3 = vpop.xlane.xlu1 %2417 }
0x12d2   :  { %v2420_v4 = vmul.f32 0.03125, %v2418_v3  ;;  %v2415_v5 = vpop.xlane.xlu0 %2414  ;;  %v3313_v3 = vpack.c.bf16 %v2621_v0, %v2617_v63 }
0x12d3   :  { %v2419_v6 = vmul.f32 0.03125, %v2415_v5  ;;  %v2623_v5 = vld [vmem:[%s4102_s20 + $0x30] sm:$0xff] }
0x12d4   :  { %v2432_v8 = vmul.f32 %v2420_v4, %v2420_v4  ;;  %v2436_v37 = vsub.f32 %v2408_v49, %v2420_v4  ;;  %v2619_v4 = vld [vmem:[%s4102_s20 + $0x10] sm:$0xff] }
0x12d5   :  { %v2428_v7 = vpop.xlane.xlu1 %2427  ;;  %v2431_v13 = vmul.f32 %v2419_v6, %v2419_v6  ;;  %v2435_v19 = vsub.f32 %v2407_v50, %v2419_v6  ;;  %v3321_v6 = vpack.c.bf16 %v2623_v5, %v2619_v4 }
0x12d6   :  { %v2430_v9 = vmul.f32 0.03125, %v2428_v7  ;;  %v2425_v12 = vpop.xlane.xlu0 %2424  ;;  %v2626_v7 = vld [vmem:[%s4102_s20 + $0x48] sm:$0xff] }
0x12d7   :  { %v2429_v14 = vmul.f32 0.03125, %v2425_v12  ;;  %3322 = vmatpush1.bf16.msra.mxu0 %v3321_v6 }
0x12d8   :  { %v2434_v15 = vsub.f32 %v2430_v9, %v2432_v8  ;;  %v2630_v8 = vld [vmem:[%s4102_s20 + $0x68] sm:$0xff]  ;;  %v2628_v9 = vld [vmem:[%s4102_s20 + $0x58] sm:$0xff] }
0x12d9   :  { %v2433_v16 = vsub.f32 %v2429_v14, %v2431_v13  ;;  %v3315_v12 = vpack.c.bf16 %v2630_v8, %v2626_v7  ;;  %v2632_v13 = vld [vmem:[%s4102_s20 + $0x78] sm:$0xff]  ;;  %v2625_v14 = vld [vmem:[%s4102_s20 + $0x40] sm:$0xff] }
0x12da   :  { %v2438_v17 = vadd.f32 1e-12, %v2434_v15  ;;  %v2629_v15 = vld [vmem:[%s4102_s20 + $0x60] sm:$0xff] }
0x12db   :  { %v2437_v39 = vadd.f32 1e-12, %v2433_v16  ;;  %v3323_v16 = vpack.c.bf16 %v2632_v13, %v2628_v9 }
0x12dc   :  { %3392 = vrsqrt.f32 %v2438_v17  ;;  %v3317_v17 = vpack.c.bf16 %v2629_v15, %v2625_v14 }
0x12dd   :  { %3394 = vrsqrt.f32 %v2437_v39  ;;  %v2627_v39 = vld [vmem:[%s4102_s20 + $0x50] sm:$0xff]  ;;  %3324 = vmatprep.subr.bf16.mxu0 %v3323_v16 }
0x12e6   :  { %v3393_v18 = vpop.eup %3392 }
0x12e7   :  { %v3395_v21 = vpop.eup %3394  ;;  %v2442_v22 = vmul.f32 %v3393_v18, %v2436_v37  ;;  %v2631_v37 = vld [vmem:[%s4102_s20 + $0x70] sm:$0xff] }
0x12e8   :  { %v2441_v23 = vmul.f32 %v3395_v21, %v2435_v19  ;;  %v3325_v18 = vpack.c.bf16 %v2631_v37, %v2627_v39 }
0x12e9   :  { %v2450_v25 = vmul.f32 %v2923_v20, %v2442_v22 }
0x12ea   :  { %v2449_v26 = vmul.f32 %v2923_v20, %v2441_v23  ;;  %3326 = vmatpush1.bf16.msra.mxu0 %v3325_v18 }
0x12eb   :  { %v2458_v28 = vadd.f32 %v2924_v24, %v2450_v25 }
0x12ec   :  { %v2457_v27 = vadd.f32 %v2924_v24, %v2449_v26 }
0x12ee   :  { %3220 = vmatprep.mubr.msk.f32.mxu1 %vm80_vm0, %v2457_v27 }
0x12ef   :  { %3221 = vmatmul.mubr.msk.f32.vlgmr.msra.gmra.mrb[28].mxu1 %vm80_vm0, %v2458_v28 }
0x12f0   :  { %2725 = vmatprep.mubr.f32.mxu1 %v3428_v40  ;;  %3314 = vmatpush1.bf16.msra.mxu1 %v3313_v3 }
0x12f1   :  { %3316 = vmatprep.subr.bf16.mxu1 %v3315_v12 }
0x12f4   :  { %3318 = vmatpush1.bf16.msra.mxu1 %v3317_v17 }
0x13c2   :  { %v3222_v30 = vpop.f32.mrb[28].mxu1 }
0x13c3   :  { %v2548_v31 = vadd.f32 %v3222_v30, %v2925_v29  ;;  %v2542_v32 = vpop.f32.mrb[29].mxu1 }
0x13c4   :  { %v2543_v33 = vadd.f32 %v2925_v29, %v2542_v32 }
0x13c5   :  { %v2552_v34 = vmul.f32 %v2548_v31, %v2548_v31 }
0x13c6   :  { %v2551_v52 = vmul.f32 %v2543_v33, %v2543_v33 }
0x13c7   :  { %v2554_v35 = vmul.f32 %v2552_v34, %v2548_v31 }
0x13c8   :  { %v2553_v36 = vmul.f32 %v2551_v52, %v2543_v33  ;;  %v2928_v52 = vld [vmem:[%s4100_s18] ss:$0 sm:$0xff] }
0x13c9   :  { %v2556_v56 = vmul.f32 0.044715, %v2554_v35 }
0x13ca   :  { %v2555_v38 = vmul.f32 0.044715, %v2553_v36  ;;  %v2929_v36 = vld [vmem:[%s4101_s19] ss:$0 sm:$0xff] }
0x13cb   :  { %v2558_v41 = vadd.f32 %v2556_v56, %v2548_v31 }
0x13cc   :  { %v2557_v42 = vadd.f32 %v2555_v38, %v2543_v33 }
0x13cd   :  { %v2560_v43 = vmul.f32 0.7978846, %v2558_v41 }
0x13ce   :  { %v2559_v11 = vmul.f32 0.7978846, %v2557_v42 }
0x13cf   :  { %3396 = vtanh.f32 %v2560_v43 }
0x13d0   :  { %3398 = vtanh.f32 %v2559_v11 }
0x13d9   :  { %v3397_v10 = vpop.eup %3396 }
0x13da   :  { %v3399_v44 = vpop.eup %3398  ;;  %v2564_v62 = vadd.f32 1.0, %v3397_v10 }
0x13db   :  { %v2563_v45 = vadd.f32 1.0, %v3399_v44  ;;  %v2635_v44 = vlaneseq }
0x13dc   :  { %v2566_v2 = vmul.f32 0.5, %v2564_v62 }
0x13dd   :  { %v2565_v46 = vmul.f32 0.5, %v2563_v45  ;;  %v2636_v62 = vshrl.u32 %v2635_v44, 7 }
0x13de   :  { %v3993_v48 = vmul.f32 %v2566_v2, %v2548_v31 }
0x13df   :  { %v3991_v47 = vmul.f32 %v2565_v46, %v2543_v33  ;;  %v2637_v45 = vsub.s32 0, %v2636_v62  ;;  %v2645_v2 = vsub.s32 2, %v2636_v62  ;;  %v2633_v46 = vld [vmem:[%s4103_s21] sm:$0xf]  ;;  %s3404_s21 = scalar_lea.vmem %s2829_s11, 1024 }
0x13e0   :  { %v2580_v53 = vmul.f32 %v3993_v48, %v3993_v48  ;;  %v2574_v54 = vsel %vm80_vm0, %v3993_v48, 0.0  ;;  %p3405_p0 = scmp.ne.s32.totalorder %s2829_s11, %s3404_s21  ;;  %p3410_p2 = scmp.lt.s32.totalorder %s3404_s21, %s3404_s21 }
0x13e1   :  { %v2571_v49 = vsel %vm80_vm0, %v3991_v47, 0.0  ;;  %v2579_v50 = vmul.f32 %v3991_v47, %v3991_v47 }
0x13e2   :  { %2572 = vadd.xlane.f32.xlu0 %v2571_v49  ;;  %v2584_v55 = vsel %vm80_vm0, %v2580_v53, 0.0  ;;  %v2638_v49 = vrot.slane %v2633_v46, %v2637_v45  ;;  %p3411_p3 = por %p3410_p2, %p3409_p1 }
0x13e3   :  { %v2581_v51 = vsel %vm80_vm0, %v2579_v50, 0.0  ;;  %v2646_v50 = vrot.slane %v2633_v46, %v2645_v2 }
0x13e4   :  { %2582 = vadd.xlane.f32.xlu1 %v2581_v51  ;;  %p3412_p4 = pnand %p3411_p3, %p3405_p0 }
0x13e6   :  { %2575 = vadd.xlane.f32.xlu0 %v2574_v54 }
0x13e8   :  { %2585 = vadd.xlane.f32.xlu1 %v2584_v55 }
0x146f   :  { %v2573_v19 = vpop.xlane.xlu0 %2572 }
0x1470   :  { %v2577_v20 = vmul.f32 0.03125, %v2573_v19 }
0x1471   :  { %v2583_v21 = vpop.xlane.xlu1 %2582 }
0x1472   :  { %v2589_v22 = vmul.f32 %v2577_v20, %v2577_v20  ;;  %v2587_v23 = vmul.f32 0.03125, %v2583_v21  ;;  %v2593_v33 = vsub.f32 %v3991_v47, %v2577_v20  ;;  %v2641_v47 = vsub.s32 1, %v2636_v62 }
0x1473   :  { %v2576_v24 = vpop.xlane.xlu0 %2575 }
0x1474   :  { %v2591_v25 = vsub.f32 %v2587_v23, %v2589_v22  ;;  %v2578_v26 = vmul.f32 0.03125, %v2576_v24  ;;  %v2642_v51 = vrot.slane %v2633_v46, %v2641_v47 }
0x1475   :  { %v2586_v27 = vpop.xlane.xlu1 %2585 }
0x1476   :  { %v2595_v28 = vadd.f32 1e-12, %v2591_v25  ;;  %v2590_v29 = vmul.f32 %v2578_v26, %v2578_v26  ;;  %v2588_v30 = vmul.f32 0.03125, %v2586_v27  ;;  %v2594_v56 = vsub.f32 %v3993_v48, %v2578_v26 }
0x1477   :  { %v2649_v48 = vsub.s32 3, %v2636_v62 }
0x1478   :  { %3400 = vrsqrt.f32 %v2595_v28  ;;  %v2592_v31 = vsub.f32 %v2588_v30, %v2590_v29 }
0x1479   :  { %v2650_v53 = vrot.slane %v2633_v46, %v2649_v48 }
0x147a   :  { %v2596_v32 = vadd.f32 1e-12, %v2592_v31 }
0x147c   :  { %3402 = vrsqrt.f32 %v2596_v32 }
0x1482   :  { %v3401_v34 = vpop.eup %3400 }
0x1483   :  { %v2599_v35 = vmul.f32 %v3401_v34, %v2593_v33 }
0x1485   :  { %v2607_v38 = vmul.f32 %v2928_v52, %v2599_v35 }
0x1486   :  { %v3403_v41 = vpop.eup %3402 }
0x1487   :  { %v2615_v42 = vadd.f32 %v2929_v36, %v2607_v38  ;;  %v2600_v43 = vmul.f32 %v3403_v41, %v2594_v56 }
0x1489   :  { %2930 = vmatmul.mubr.msk.f32.vlgmr.msra.gmra.mrb[30].mxu1 %vm80_vm0, %v2615_v42  ;;  %2932 = vmatmul.mubr.msk.f32.vlgmr.msra.gmra.mrb[20].mxu0 %vm80_vm0, %v2615_v42  ;;  %v2608_v11 = vmul.f32 %v2928_v52, %v2600_v43 }
0x148a   :  { %2731 = vmatprep.mubr.f32.mxu1 %v3428_v40  ;;  %2808 = vmatprep.mubr.f32.mxu0 %v3428_v40 }
0x148b   :  { %v2616_v10 = vadd.f32 %v2929_v36, %v2608_v11 }
0x148d   :  { %2931 = vmatmul.mubr.msk.f32.gmra.mrb[32].mxu1 %vm80_vm0, %v2616_v10  ;;  %2933 = vmatmul.mubr.msk.f32.gmra.mrb[22].mxu0 %vm80_vm0, %v2616_v10 }
0x155c   :  { %v2727_v40 = vpop.f32.mrb[30].mxu1  ;;  %v2804_v54 = vpop.f32.mrb[20].mxu0 }
0x155d   :  { %v2728_v55 = vadd.f32 %v2727_v40, %v2638_v49  ;;  %v2805_v57 = vadd.f32 %v2804_v54, %v2646_v50  ;;  %v2729_v58 = vpop.f32.mrb[31].mxu1  ;;  %v2806_v59 = vpop.f32.mrb[21].mxu0 }
0x155e   :  { %v2730_v60 = vadd.f32 %v2729_v58, %v2642_v51  ;;  %v2807_v61 = vadd.f32 %v2806_v59, %v2650_v53 }
0x155f   :  { %2815 = vst [vmem:[#allocation2] sm:$0xff] %v2728_v55  ;;  %2817 = vst [vmem:[#allocation2 + $0x10] sm:$0xff] %v2805_v57 }
0x1560   :  { %2816 = vst [vmem:[#allocation2 + $0x8] sm:$0xff] %v2730_v60  ;;  %2818 = vst [vmem:[#allocation2 + $0x18] sm:$0xff] %v2807_v61  ;;  %v2733_v63 = vpop.f32.mrb[32].mxu1  ;;  %v2810_v0 = vpop.f32.mrb[22].mxu0 }
0x1561   :  { %v2734_v1 = vadd.f32 %v2733_v63, %v2638_v49  ;;  %v2811_v3 = vadd.f32 %v2810_v0, %v2646_v50  ;;  %v2735_v4 = vpop.f32.mrb[33].mxu1  ;;  %v2812_v5 = vpop.f32.mrb[23].mxu0 }
0x1562   :  { %v2736_v6 = vadd.f32 %v2735_v4, %v2642_v51  ;;  %v2813_v7 = vadd.f32 %v2812_v5, %v2650_v53 }
0x1563   :  { %2819 = vst [vmem:[#allocation2 + $0x20] sm:$0xff] %v2734_v1  ;;  %2821 = vst [vmem:[#allocation2 + $0x30] sm:$0xff] %v2811_v3 }
0x1564   :  { %2820 = vst [vmem:[#allocation2 + $0x28] sm:$0xff] %v2736_v6  ;;  %2822 = vst [vmem:[#allocation2 + $0x38] sm:$0xff] %v2813_v7 }
0x1565   :  { %3415 = shalt.err (!%p3412_p4)
}
0x1566   :  { %s3416_s30 = scalar_lea.hbm %s4104_s22, 1024 }
0x1567   :  { %p3417_p5 = scmp.ne.s32.totalorder %s4104_s22, %s3416_s30  ;;  %p3420_p6 = scmp.lt.u32.totalorder %s3416_s30, %s4104_s22 }
0x1569   :  { %p3422_p7 = pnand %p3420_p6, %p3417_p5 }
0x156b   :  { %3425 = shalt.err (!%p3422_p7)
}
0x156c   :  { %s3435_s9 = smov 512   ;;  %s3436_s26 = smov 32  }
0x156d   :  { %2834 = dma.vmem_to_hbm [thread:$0]  %s2829_s11, 1024, %s4104_s22, [#allocation3], %s3435_s9, %s3435_s9, %s3436_s26  }
0x156e   :  { %3426 = dma.done.wait [#allocation3], 1024  }
0x156f   :  { %3427 = vsyncadd [#allocation3], 4294966272 }
0x1570   :  { %2838 = vsyncpa [#allocation3], 1 }

</bundles_post_ra>
